<compile_context>
chip_gen: v7x
topology: tpu7x:2x2x1
jax: 0.10.0
libtpu: 0.0.40
codegen_flags: <defaults>
</compile_context>

<pallas_src>
import functools
import math

import jax
import jax.numpy as jnp
from jax.experimental import pallas as pl
from jax.experimental.pallas import tpu as pltpu


def _round_up(x, m):
    return (x + m - 1) // m * m


# ----------------------------- fused Pallas kernel ---------------------------


def _fused_forward_kernel(*refs, batch, ksize, pad, data_off, layers):
    """Entire EEGSimpleConv forward in one kernel invocation (no grid).

    Activation slabs are time-major (rows = batch-interleaved padded time,
    lanes = channels).  Per batch element the segment layout is
      [data_off zero rows | l data rows | zero rows up to the 8-aligned stride]
    so the conv "same" zero padding is part of the layout, per-batch data
    stores start on 8-sublane boundaries, and one
    (rows, K*C_in) @ (K*C_in, C_out) matmul per layer does the conv for the
    whole batch.

    refs: x0, mask, P, (w, gamma, beta) x n_layers, fc_wT, fc_b | out |
          acc scratch, ping stage, pong stage
    layers[j] = (c_in, c_out, l_in, l_out, s_in, s_out, pool)
    """
    eps = jnp.float32(1e-5)
    n_layers = len(layers)
    x0_ref, mask_ref, p_ref = refs[0], refs[1], refs[2]
    layer_refs = [(refs[3 + 3 * j], refs[4 + 3 * j], refs[5 + 3 * j])
                  for j in range(n_layers)]
    fc_w_ref = refs[3 + 3 * n_layers]
    fc_b_ref = refs[4 + 3 * n_layers]
    out_ref = refs[5 + 3 * n_layers]
    acc_ref = refs[6 + 3 * n_layers]
    stage = (refs[7 + 3 * n_layers], refs[8 + 3 * n_layers])

    src_ref = x0_ref
    for li, (c_in, c_out, l_in, l_out, s_in, s_out, pool) in enumerate(layers):
        w_ref, g_ref, beta_ref = layer_refs[li]
        is_last = li == n_layers - 1
        rows = batch * s_in - (ksize - 1)        # conv output rows, all batches

        # ---- Conv1d (no bias): K taps folded into the MXU contraction dim,
        # bf16 operands, f32 accumulation.  One matmul per layer.
        taps = [src_ref[t:t + rows, 0:c_in] for t in range(ksize)]
        stacked = jnp.concatenate(taps, axis=1) if ksize > 1 else taps[0]
        acc = jnp.dot(stacked.astype(jnp.bfloat16), w_ref[...],
                      preferred_element_type=jnp.float32)
        # Park the conv output in VMEM scratch so the per-batch regroup loop
        # below reads it with pl.ds (bounded live ranges, no giant live value).
        acc_ref[0:rows, 0:c_out] = acc

        # ---- BatchNorm1d batch statistics (training mode), f32, masked to the
        # valid rows, numerically stable two-pass (centered) variance.
        mask = mask_ref[0:rows, li:li + 1]
        inv_n = jnp.float32(1.0 / (batch * l_in))
        mean = jnp.sum(jnp.where(mask > 0.0, acc, 0.0),
                       axis=0, keepdims=True) * inv_n
        cent = jnp.where(mask > 0.0, acc_ref[0:rows, 0:c_out] - mean, 0.0)
        var = jnp.sum(cent * cent, axis=0, keepdims=True) * inv_n
        scale = g_ref[...] * jax.lax.rsqrt(var + eps)
        shift = beta_ref[...] - mean * scale

        if not is_last:
            dst_ref = stage[li % 2]
            tail = s_out - data_off - l_out
            zeros_head = jnp.zeros((data_off, c_out), jnp.float32)
            zeros_tail = jnp.zeros((tail, c_out), jnp.float32) if tail > 0 else None

            # BN affine -> (MaxPool1d(2)) -> ReLU -> regroup into the next
            # layer's padded, 8-aligned slab.  Only the padding rows are
            # zero-filled; data rows are stored once, at aligned offsets.
            @pl.loop(0, batch)
            def _(bi):
                in_base = pl.multiple_of(bi * s_in, 8)
                out_base = pl.multiple_of(bi * s_out, 8)
                row0 = in_base + (data_off - pad)
                if pool:
                    # MaxPool1d(2): two stride-2 sublane loads from the conv
                    # scratch, affine each, elementwise max (VPU/XLU only).
                    ev = acc_ref[pl.ds(row0, l_out, stride=2), 0:c_out]
                    od = acc_ref[pl.ds(row0 + 1, l_out, stride=2), 0:c_out]
                    z = jnp.maximum(ev * scale + shift, od * scale + shift)
                else:
                    z = acc_ref[pl.ds(row0, l_in), 0:c_out] * scale + shift
                z = jnp.maximum(z, jnp.float32(0.0))                     # ReLU
                dst_ref[pl.ds(out_base, data_off), 0:c_out] = zeros_head
                if tail > 0:
                    dst_ref[pl.ds(out_base + data_off + l_out, tail),
                            0:c_out] = zeros_tail
                dst_ref[pl.ds(pl.multiple_of(out_base + data_off, 8), l_out),
                        0:c_out] = z

            src_ref = dst_ref
        else:
            # ---- Head: BN affine + ReLU on the whole slab, temporal mean for
            # all batch elements via ONE masked averaging matmul, Linear, and a
            # single (B, n_classes) store.
            zfull = jnp.maximum(acc_ref[0:rows, 0:c_out] * scale + shift,
                                jnp.float32(0.0))
            means = jnp.dot(p_ref[...], zfull, preferred_element_type=jnp.float32)
            out_ref[...] = (jnp.dot(means, fc_w_ref[...],
                                    preferred_element_type=jnp.float32)
                            + fc_b_ref[...])


# ----------------------------- wrapper ---------------------------------------


def eeg_simple_conv_forward(x, params, *, kernel_size, n_convs):
    """EEGSimpleConv forward (training-mode BatchNorm). x: (B, n_chan, L)."""
    b, c_in, l = x.shape
    k = kernel_size
    pad = k // 2
    assert k % 2 == 1, "only odd kernel sizes ('same' conv) are supported"
    assert l % (2 ** max(n_convs, 1)) == 0, "length must survive the maxpools"

    # Resample: sfreq == resampling in this configuration -> identity.
    # TODO(synk): general sinc-interpolation resampling (sfreq != resampling).

    data_off = max(8, _round_up(pad, 8))     # zero rows before the data rows

    def seg(l_in):                           # 8-aligned per-batch segment stride
        return data_off + _round_up(l_in + pad, 8)

    # ---- static per-layer plan -----------------------------------------------
    specs = []   # (w, gamma, beta, c_in, c_out, l_in, pool)
    fm = params["stem_w"].shape[0]
    specs.append((params["stem_w"], params["stem_g"], params["stem_b"],
                  c_in, fm, l, False))
    l_cur, c_cur = l, fm
    for i in range(n_convs):
        bp = params["blocks"][i]
        c_new = bp["w1"].shape[0]
        specs.append((bp["w1"], bp["g1"], bp["b1"], c_cur, c_new, l_cur, True))
        l_cur //= 2
        specs.append((bp["w2"], bp["g2"], bp["b2"], c_new, c_new, l_cur, False))
        c_cur = c_new
    n_layers = len(specs)

    layer_cfg = []     # (c_in, c_out, l_in, l_out, s_in, s_out, pool)
    rows_list = []
    ping = [8, 8]      # right-sized [rows, cols] per ping/pong parity
    pong = [8, 8]
    for j, (_, _, _, ci, co, lin, pool) in enumerate(specs):
        lout = lin // 2 if pool else lin
        s_in = seg(lin)
        s_out = seg(lout) if j < n_layers - 1 else 0
        layer_cfg.append((ci, co, lin, lout, s_in, s_out, pool))
        rows_list.append(b * s_in - (k - 1))
        if j < n_layers - 1:
            buf = ping if j % 2 == 0 else pong
            buf[0] = max(buf[0], b * s_out)
            buf[1] = max(buf[1], co)

    # ---- kernel inputs -------------------------------------------------------
    inputs = []

    # network input: time-major, batch-interleaved padded slab (B * S0, C_in)
    s0 = layer_cfg[0][4]
    xt = jnp.transpose(x, (0, 2, 1)).astype(jnp.float32)           # (B, L, C)
    xp = jnp.pad(xt, ((0, 0), (data_off, s0 - data_off - l), (0, 0)))
    inputs.append(xp.reshape(b * s0, c_in))

    # per-layer row-validity masks (1.0 on real conv-output rows), one lane/layer
    r_mask = max(rows_list)
    r_idx = jnp.arange(r_mask)
    cols = []
    for j, (ci, co, lin, lout, s_in, s_out, pool) in enumerate(layer_cfg):
        within = r_idx % s_in
        cols.append(((within >= data_off - pad)
                     & (within < data_off - pad + lin)
                     & (r_idx < rows_list[j])).astype(jnp.float32))
    inputs.append(jnp.stack(cols, axis=1))                         # (r_mask, n_layers)

    # head averaging matrix: means = P @ relu(BN(last conv output slab))
    _, _, l_last, _, s_last, _, _ = layer_cfg[-1]
    rows_last = rows_list[-1]
    rr = jnp.arange(rows_last)[None, :]
    bb = jnp.arange(b)[:, None]
    start = bb * s_last + (data_off - pad)
    inputs.append(((rr >= start) & (rr < start + l_last)).astype(jnp.float32)
                  / jnp.float32(l_last))                           # (B, rows_last)

    # conv weights: torch (C_out, C_in, K) -> (K*C_in, C_out) bf16 MXU operand
    for (w, g, beta, ci, co, lin, pool) in specs:
        inputs.append(jnp.transpose(w, (2, 1, 0)).reshape(k * ci, co)
                      .astype(jnp.bfloat16))
        inputs.append(g.reshape(1, co).astype(jnp.float32))
        inputs.append(beta.reshape(1, co).astype(jnp.float32))

    n_classes = params["fc_w"].shape[0]
    inputs.append(jnp.transpose(params["fc_w"]).astype(jnp.float32))
    inputs.append(params["fc_b"].reshape(1, n_classes).astype(jnp.float32))

    # ---- right-sized scratch + explicit VMEM budget --------------------------
    c_max = max(cfg[1] for cfg in layer_cfg)
    acc_rows = b * layer_cfg[0][4]            # tallest conv-output slab (rows)
    scratch = [
        pltpu.VMEM((acc_rows, c_max), jnp.float32),        # conv-output scratch
        pltpu.VMEM((ping[0], ping[1]), jnp.float32),       # stage buffer (ping)
        pltpu.VMEM((pong[0], pong[1]), jnp.float32),       # stage buffer (pong)
    ]

    def vbytes(shape, dtype):
        r = shape[-2] if len(shape) > 1 else 1
        c = shape[-1]
        return _round_up(r, 8) * _round_up(c, 128) * jnp.dtype(dtype).itemsize

    est = sum(vbytes(a.shape, a.dtype) for a in inputs)
    est += vbytes((b, n_classes), jnp.float32)
    est += vbytes((acc_rows, c_max), jnp.float32)
    est += vbytes(tuple(ping), jnp.float32) + vbytes(tuple(pong), jnp.float32)
    vmem_limit = int(min(100 * 2 ** 20, max(32 * 2 ** 20, 2 * est + (4 << 20))))

    # TODO(synk): for realistic B*L, tile the time axis with a (K-1)-row halo
    #   ("arbitrary" grid axis, BN stats accumulated across tiles) and, on v7x,
    #   add a "parallel" batch/time grid axis so both TensorCores are used.
    kern = functools.partial(_fused_forward_kernel, batch=b, ksize=k, pad=pad,
                             data_off=data_off, layers=tuple(layer_cfg))
    return pl.pallas_call(
        kern,
        out_shape=jax.ShapeDtypeStruct((b, n_classes), jnp.float32),
        scratch_shapes=scratch,
        compiler_params=pltpu.CompilerParams(vmem_limit_bytes=vmem_limit),
    )(*inputs)
    # (n_subjects is None in this configuration, so only fc(y) is returned.)


# ----------------------------- params & reference ----------------------------


def init_params(key, fm, n_convs, kernel_size, n_chan, n_classes):
    keys = iter(jax.random.split(key, 4 + 2 * n_convs))

    def w_init(kk, shape, fan_in):
        bound = 1.0 / math.sqrt(fan_in)
        return jax.random.uniform(kk, shape, jnp.float32, -bound, bound)

    params = {
        "stem_w": w_init(next(keys), (fm, n_chan, kernel_size), n_chan * kernel_size),
        "stem_g": jnp.ones((fm,), jnp.float32),
        "stem_b": jnp.zeros((fm,), jnp.float32),
        "blocks": [],
    }
    oldfm, newfm = fm, fm
    for i in range(n_convs):
        if i > 0:
            newfm = int(1.414 * newfm)
        params["blocks"].append({
            "w1": w_init(next(keys), (newfm, oldfm, kernel_size), oldfm * kernel_size),
            "g1": jnp.ones((newfm,), jnp.float32),
            "b1": jnp.zeros((newfm,), jnp.float32),
            "w2": w_init(next(keys), (newfm, newfm, kernel_size), newfm * kernel_size),
            "g2": jnp.ones((newfm,), jnp.float32),
            "b2": jnp.zeros((newfm,), jnp.float32),
        })
        oldfm = newfm
    params["fc_w"] = w_init(next(keys), (n_classes, oldfm), oldfm)
    params["fc_b"] = w_init(next(keys), (n_classes,), oldfm)
    return params


def _reference_forward(x, params, kernel_size, n_convs):
    """Plain-JAX f32 reference of the torch module's forward (for checking)."""
    pad = kernel_size // 2
    eps = 1e-5

    def conv_bn(y, w, g, beta):
        ll = y.shape[-1]
        yp = jnp.pad(y, ((0, 0), (0, 0), (pad, pad)))
        out = jnp.zeros((y.shape[0], w.shape[0], ll), jnp.float32)
        for kk in range(kernel_size):
            out = out + jnp.einsum("oi,bit->bot", w[:, :, kk], yp[:, :, kk:kk + ll])
        mean = out.mean(axis=(0, 2), keepdims=True)
        var = ((out - mean) ** 2).mean(axis=(0, 2), keepdims=True)
        return ((out - mean) * jax.lax.rsqrt(var + eps)
                * g[None, :, None] + beta[None, :, None])

    y = jax.nn.relu(conv_bn(x.astype(jnp.float32), params["stem_w"],
                            params["stem_g"], params["stem_b"]))
    for i in range(n_convs):
        bp = params["blocks"][i]
        y = conv_bn(y, bp["w1"], bp["g1"], bp["b1"])
        y = jnp.maximum(y[:, :, 0::2], y[:, :, 1::2])        # MaxPool1d(2)
        y = jax.nn.relu(y)
        y = jax.nn.relu(conv_bn(y, bp["w2"], bp["g2"], bp["b2"]))
    y = y.mean(axis=2)
    return y @ params["fc_w"].T + params["fc_b"]


# ----------------------------- main -------------------------------------------

if __name__ == "__main__":
    # Small, shape-consistent configuration (sfreq == resampling -> identity).
    fm = 8
    n_convs = 2
    kernel_size = 3
    n_chan = 4
    n_classes = 5
    batch = 2
    seq_len = 16             # divisible by 2**n_convs

    key = jax.random.PRNGKey(0)
    pkey, xkey = jax.random.split(key)
    params = init_params(pkey, fm, n_convs, kernel_size, n_chan, n_classes)
    x = jax.random.normal(xkey, (batch, n_chan, seq_len), jnp.float32)

    out = eeg_simple_conv_forward(x, params, kernel_size=kernel_size,
                                  n_convs=n_convs)
    out = jax.block_until_ready(out)
    assert out.shape == (batch, n_classes), out.shape
    assert bool(jnp.all(jnp.isfinite(out)))

    # Loose tolerance: conv matmul operands are bf16 (MXU native); accumulation,
    # BatchNorm statistics and all affine/ReLU math stay in f32.
    ref = _reference_forward(x, params, kernel_size, n_convs)
    err = float(jnp.max(jnp.abs(out - ref)))
    assert err < 0.2, err
    print("KERNEL_OK")
</pallas_src>

<mosaic_0001>
module attributes {stable_mosaic.version = 11 : i64} {
  func.func @_fused_forward_kernel(%arg0: memref<64x4xf32, #tpu.memory_space<vmem>>, %arg1: memref<62x5xf32, #tpu.memory_space<vmem>>, %arg2: memref<2x30xf32, #tpu.memory_space<vmem>>, %arg3: memref<12x8xbf16, #tpu.memory_space<vmem>>, %arg4: memref<1x8xf32, #tpu.memory_space<vmem>>, %arg5: memref<1x8xf32, #tpu.memory_space<vmem>>, %arg6: memref<24x8xbf16, #tpu.memory_space<vmem>>, %arg7: memref<1x8xf32, #tpu.memory_space<vmem>>, %arg8: memref<1x8xf32, #tpu.memory_space<vmem>>, %arg9: memref<24x8xbf16, #tpu.memory_space<vmem>>, %arg10: memref<1x8xf32, #tpu.memory_space<vmem>>, %arg11: memref<1x8xf32, #tpu.memory_space<vmem>>, %arg12: memref<24x11xbf16, #tpu.memory_space<vmem>>, %arg13: memref<1x11xf32, #tpu.memory_space<vmem>>, %arg14: memref<1x11xf32, #tpu.memory_space<vmem>>, %arg15: memref<33x11xbf16, #tpu.memory_space<vmem>>, %arg16: memref<1x11xf32, #tpu.memory_space<vmem>>, %arg17: memref<1x11xf32, #tpu.memory_space<vmem>>, %arg18: memref<11x5xf32, #tpu.memory_space<vmem>>, %arg19: memref<1x5xf32, #tpu.memory_space<vmem>>, %arg20: memref<2x5xf32, #tpu.memory_space<vmem>>, %arg21: memref<64x11xf32, #tpu.memory_space<vmem>>, %arg22: memref<64x8xf32, #tpu.memory_space<vmem>>, %arg23: memref<48x11xf32, #tpu.memory_space<vmem>>) attributes {dimension_semantics = [], scalar_prefetch = 0 : i64, scratch_operands = 3 : i64, tpu.core_type = #tpu.core_type<tc>} {
    %c0 = arith.constant 0 : index
    %c0_0 = arith.constant 0 : index
    %0 = vector.load %arg0[%c0, %c0_0] : memref<64x4xf32, #tpu.memory_space<vmem>>, vector<62x4xf32>
    %c1 = arith.constant 1 : index
    %c0_1 = arith.constant 0 : index
    %1 = vector.load %arg0[%c1, %c0_1] : memref<64x4xf32, #tpu.memory_space<vmem>>, vector<62x4xf32>
    %c2 = arith.constant 2 : index
    %c0_2 = arith.constant 0 : index
    %2 = vector.load %arg0[%c2, %c0_2] : memref<64x4xf32, #tpu.memory_space<vmem>>, vector<62x4xf32>
    %3 = tpu.concatenate %0, %1, %2 in 1 : vector<62x4xf32>, vector<62x4xf32>, vector<62x4xf32> -> vector<62x12xf32>
    %4 = arith.truncf %3 : vector<62x12xf32> to vector<62x12xbf16>
    %c0_3 = arith.constant 0 : index
    %c0_4 = arith.constant 0 : index
    %5 = vector.load %arg3[%c0_3, %c0_4] : memref<12x8xbf16, #tpu.memory_space<vmem>>, vector<12x8xbf16>
    %cst = arith.constant dense<0.000000e+00> : vector<62x8xf32>
    %6 = tpu.matmul %4, %5, %cst {dimension_numbers = #tpu.dot_dimension_numbers<[1], [0], [0], [1], [0, 0, 1, 1], [], []>} : vector<62x12xbf16>, vector<12x8xbf16>, vector<62x8xf32> -> vector<62x8xf32>
    %c0_5 = arith.constant 0 : index
    %c0_6 = arith.constant 0 : index
    %7 = vector.load %arg21[%c0_5, %c0_6] : memref<64x11xf32, #tpu.memory_space<vmem>>, vector<62x8xf32>
    tpu.vector_store %arg21[%c0_5, %c0_6], %6 {strides = array<i32>} : memref<64x11xf32, #tpu.memory_space<vmem>>, vector<62x8xf32>,
    %c0_7 = arith.constant 0 : index
    %c0_8 = arith.constant 0 : index
    %8 = vector.load %arg1[%c0_7, %c0_8] : memref<62x5xf32, #tpu.memory_space<vmem>>, vector<62x1xf32>
    %cst_9 = arith.constant 0.000000e+00 : f32
    %9 = vector.broadcast %cst_9 : f32 to vector<62x1xf32>
    %10 = arith.cmpf ogt, %8, %9 : vector<62x1xf32>
    %cst_10 = arith.constant 0.000000e+00 : f32
    %11 = vector.shape_cast %10 : vector<62x1xi1> to vector<62x1xi1>
    %12 = vector.broadcast %11 : vector<62x1xi1> to vector<62x8xi1>
    %13 = vector.broadcast %cst_10 : f32 to vector<62x8xf32>
    %14 = arith.select %12, %6, %13 : vector<62x8xi1>, vector<62x8xf32>
    %cst_11 = arith.constant dense<0.000000e+00> : vector<8xf32>
    %15 = vector.multi_reduction <add>, %14, %cst_11 [0] : vector<62x8xf32> to vector<8xf32>
    %16 = vector.shape_cast %15 : vector<8xf32> to vector<1x8xf32>
    %cst_12 = arith.constant 3.125000e-02 : f32
    %17 = vector.broadcast %cst_12 : f32 to vector<1x8xf32>
    %18 = arith.mulf %16, %17 : vector<1x8xf32>
    %cst_13 = arith.constant 0.000000e+00 : f32
    %19 = vector.broadcast %cst_13 : f32 to vector<62x1xf32>
    %20 = arith.cmpf ogt, %8, %19 : vector<62x1xf32>
    %c0_14 = arith.constant 0 : index
    %c0_15 = arith.constant 0 : index
    %21 = vector.load %arg21[%c0_14, %c0_15] : memref<64x11xf32, #tpu.memory_space<vmem>>, vector<62x8xf32>
    %22 = vector.broadcast %18 : vector<1x8xf32> to vector<62x8xf32>
    %23 = arith.subf %21, %22 : vector<62x8xf32>
    %cst_16 = arith.constant 0.000000e+00 : f32
    %24 = vector.shape_cast %20 : vector<62x1xi1> to vector<62x1xi1>
    %25 = vector.broadcast %24 : vector<62x1xi1> to vector<62x8xi1>
    %26 = vector.broadcast %cst_16 : f32 to vector<62x8xf32>
    %27 = arith.select %25, %23, %26 : vector<62x8xi1>, vector<62x8xf32>
    %28 = arith.mulf %27, %27 : vector<62x8xf32>
    %cst_17 = arith.constant dense<0.000000e+00> : vector<8xf32>
    %29 = vector.multi_reduction <add>, %28, %cst_17 [0] : vector<62x8xf32> to vector<8xf32>
    %30 = vector.shape_cast %29 : vector<8xf32> to vector<1x8xf32>
    %cst_18 = arith.constant 3.125000e-02 : f32
    %31 = vector.broadcast %cst_18 : f32 to vector<1x8xf32>
    %32 = arith.mulf %30, %31 : vector<1x8xf32>
    %c0_19 = arith.constant 0 : index
    %c0_20 = arith.constant 0 : index
    %33 = vector.load %arg4[%c0_19, %c0_20] : memref<1x8xf32, #tpu.memory_space<vmem>>, vector<1x8xf32>
    %cst_21 = arith.constant 9.99999974E-6 : f32
    %34 = vector.broadcast %cst_21 : f32 to vector<1x8xf32>
    %35 = arith.addf %32, %34 : vector<1x8xf32>
    %36 = math.rsqrt %35 : vector<1x8xf32>
    %37 = arith.mulf %33, %36 : vector<1x8xf32>
    %c0_22 = arith.constant 0 : index
    %c0_23 = arith.constant 0 : index
    %38 = vector.load %arg5[%c0_22, %c0_23] : memref<1x8xf32, #tpu.memory_space<vmem>>, vector<1x8xf32>
    %39 = arith.mulf %18, %37 : vector<1x8xf32>
    %40 = arith.subf %38, %39 : vector<1x8xf32>
    %cst_24 = arith.constant 0.000000e+00 : f32
    %41 = vector.broadcast %cst_24 : f32 to vector<8x8xf32>
    %cst_25 = arith.constant 0.000000e+00 : f32
    %42 = vector.broadcast %cst_25 : f32 to vector<8x8xf32>
    %c0_i32 = arith.constant 0 : i32
    %c2_i32 = arith.constant 2 : i32
    %43 = arith.addi %c0_i32, %c2_i32 : i32
    %c1_i32 = arith.constant 1 : i32
    scf.for %arg24 = %c0_i32 to %43 step %c1_i32  : i32 {
      %c1_i32_168 = arith.constant 1 : i32
      %232 = arith.muli %arg24, %c1_i32_168 : i32
      %c0_i32_169 = arith.constant 0 : i32
      %233 = arith.addi %c0_i32_169, %232 : i32
      %c32_i32 = arith.constant 32 : i32
      %234 = arith.muli %233, %c32_i32 : i32
      %235 = tpu.assume_multiple %234, 8 : i32
      %c32_i32_170 = arith.constant 32 : i32
      %236 = arith.muli %233, %c32_i32_170 : i32
      %237 = tpu.assume_multiple %236, 8 : i32
      %c7_i32 = arith.constant 7 : i32
      %238 = arith.addi %235, %c7_i32 : i32
      %239 = arith.index_cast %238 : i32 to index
      %c0_171 = arith.constant 0 : index
      %240 = vector.load %arg21[%239, %c0_171] : memref<64x11xf32, #tpu.memory_space<vmem>>, vector<16x8xf32>
      %241 = vector.broadcast %37 : vector<1x8xf32> to vector<16x8xf32>
      %242 = arith.mulf %240, %241 : vector<16x8xf32>
      %243 = vector.broadcast %40 : vector<1x8xf32> to vector<16x8xf32>
      %244 = arith.addf %242, %243 : vector<16x8xf32>
      %cst_172 = arith.constant 0.000000e+00 : f32
      %245 = vector.broadcast %cst_172 : f32 to vector<16x8xf32>
      %246 = arith.maximumf %244, %245 : vector<16x8xf32>
      %247 = arith.index_cast %237 : i32 to index
      %c0_173 = arith.constant 0 : index
      %248 = vector.load %arg22[%247, %c0_173] : memref<64x8xf32, #tpu.memory_space<vmem>>, vector<8x8xf32>
      tpu.vector_store %arg22[%247, %c0_173], %41 {strides = array<i32>} : memref<64x8xf32, #tpu.memory_space<vmem>>, vector<8x8xf32>,
      %c8_i32 = arith.constant 8 : i32
      %249 = arith.addi %237, %c8_i32 : i32
      %c16_i32 = arith.constant 16 : i32
      %250 = arith.addi %249, %c16_i32 : i32
      %251 = arith.index_cast %250 : i32 to index
      %c0_174 = arith.constant 0 : index
      %252 = vector.load %arg22[%251, %c0_174] : memref<64x8xf32, #tpu.memory_space<vmem>>, vector<8x8xf32>
      tpu.vector_store %arg22[%251, %c0_174], %42 {strides = array<i32>} : memref<64x8xf32, #tpu.memory_space<vmem>>, vector<8x8xf32>,
      %c8_i32_175 = arith.constant 8 : i32
      %253 = arith.addi %237, %c8_i32_175 : i32
      %254 = tpu.assume_multiple %253, 8 : i32
      %255 = arith.index_cast %254 : i32 to index
      %c0_176 = arith.constant 0 : index
      %256 = vector.load %arg22[%255, %c0_176] : memref<64x8xf32, #tpu.memory_space<vmem>>, vector<16x8xf32>
      tpu.vector_store %arg22[%255, %c0_176], %246 {strides = array<i32>} : memref<64x8xf32, #tpu.memory_space<vmem>>, vector<16x8xf32>,
    }
    %c2_i32_26 = arith.constant 2 : i32
    %c0_27 = arith.constant 0 : index
    %c0_28 = arith.constant 0 : index
    %44 = vector.load %arg22[%c0_27, %c0_28] : memref<64x8xf32, #tpu.memory_space<vmem>>, vector<62x8xf32>
    %c1_29 = arith.constant 1 : index
    %c0_30 = arith.constant 0 : index
    %45 = vector.load %arg22[%c1_29, %c0_30] : memref<64x8xf32, #tpu.memory_space<vmem>>, vector<62x8xf32>
    %c2_31 = arith.constant 2 : index
    %c0_32 = arith.constant 0 : index
    %46 = vector.load %arg22[%c2_31, %c0_32] : memref<64x8xf32, #tpu.memory_space<vmem>>, vector<62x8xf32>
    %47 = tpu.concatenate %44, %45, %46 in 1 : vector<62x8xf32>, vector<62x8xf32>, vector<62x8xf32> -> vector<62x24xf32>
    %48 = arith.truncf %47 : vector<62x24xf32> to vector<62x24xbf16>
    %c0_33 = arith.constant 0 : index
    %c0_34 = arith.constant 0 : index
    %49 = vector.load %arg6[%c0_33, %c0_34] : memref<24x8xbf16, #tpu.memory_space<vmem>>, vector<24x8xbf16>
    %cst_35 = arith.constant dense<0.000000e+00> : vector<62x8xf32>
    %50 = tpu.matmul %48, %49, %cst_35 {dimension_numbers = #tpu.dot_dimension_numbers<[1], [0], [0], [1], [0, 0, 1, 1], [], []>} : vector<62x24xbf16>, vector<24x8xbf16>, vector<62x8xf32> -> vector<62x8xf32>
    %c0_36 = arith.constant 0 : index
    %c0_37 = arith.constant 0 : index
    %51 = vector.load %arg21[%c0_36, %c0_37] : memref<64x11xf32, #tpu.memory_space<vmem>>, vector<62x8xf32>
    tpu.vector_store %arg21[%c0_36, %c0_37], %50 {strides = array<i32>} : memref<64x11xf32, #tpu.memory_space<vmem>>, vector<62x8xf32>,
    %c0_38 = arith.constant 0 : index
    %c1_39 = arith.constant 1 : index
    %52 = vector.load %arg1[%c0_38, %c1_39] : memref<62x5xf32, #tpu.memory_space<vmem>>, vector<62x1xf32>
    %cst_40 = arith.constant 0.000000e+00 : f32
    %53 = vector.broadcast %cst_40 : f32 to vector<62x1xf32>
    %54 = arith.cmpf ogt, %52, %53 : vector<62x1xf32>
    %cst_41 = arith.constant 0.000000e+00 : f32
    %55 = vector.shape_cast %54 : vector<62x1xi1> to vector<62x1xi1>
    %56 = vector.broadcast %55 : vector<62x1xi1> to vector<62x8xi1>
    %57 = vector.broadcast %cst_41 : f32 to vector<62x8xf32>
    %58 = arith.select %56, %50, %57 : vector<62x8xi1>, vector<62x8xf32>
    %cst_42 = arith.constant dense<0.000000e+00> : vector<8xf32>
    %59 = vector.multi_reduction <add>, %58, %cst_42 [0] : vector<62x8xf32> to vector<8xf32>
    %60 = vector.shape_cast %59 : vector<8xf32> to vector<1x8xf32>
    %cst_43 = arith.constant 3.125000e-02 : f32
    %61 = vector.broadcast %cst_43 : f32 to vector<1x8xf32>
    %62 = arith.mulf %60, %61 : vector<1x8xf32>
    %cst_44 = arith.constant 0.000000e+00 : f32
    %63 = vector.broadcast %cst_44 : f32 to vector<62x1xf32>
    %64 = arith.cmpf ogt, %52, %63 : vector<62x1xf32>
    %c0_45 = arith.constant 0 : index
    %c0_46 = arith.constant 0 : index
    %65 = vector.load %arg21[%c0_45, %c0_46] : memref<64x11xf32, #tpu.memory_space<vmem>>, vector<62x8xf32>
    %66 = vector.broadcast %62 : vector<1x8xf32> to vector<62x8xf32>
    %67 = arith.subf %65, %66 : vector<62x8xf32>
    %cst_47 = arith.constant 0.000000e+00 : f32
    %68 = vector.shape_cast %64 : vector<62x1xi1> to vector<62x1xi1>
    %69 = vector.broadcast %68 : vector<62x1xi1> to vector<62x8xi1>
    %70 = vector.broadcast %cst_47 : f32 to vector<62x8xf32>
    %71 = arith.select %69, %67, %70 : vector<62x8xi1>, vector<62x8xf32>
    %72 = arith.mulf %71, %71 : vector<62x8xf32>
    %cst_48 = arith.constant dense<0.000000e+00> : vector<8xf32>
    %73 = vector.multi_reduction <add>, %72, %cst_48 [0] : vector<62x8xf32> to vector<8xf32>
    %74 = vector.shape_cast %73 : vector<8xf32> to vector<1x8xf32>
    %cst_49 = arith.constant 3.125000e-02 : f32
    %75 = vector.broadcast %cst_49 : f32 to vector<1x8xf32>
    %76 = arith.mulf %74, %75 : vector<1x8xf32>
    %c0_50 = arith.constant 0 : index
    %c0_51 = arith.constant 0 : index
    %77 = vector.load %arg7[%c0_50, %c0_51] : memref<1x8xf32, #tpu.memory_space<vmem>>, vector<1x8xf32>
    %cst_52 = arith.constant 9.99999974E-6 : f32
    %78 = vector.broadcast %cst_52 : f32 to vector<1x8xf32>
    %79 = arith.addf %76, %78 : vector<1x8xf32>
    %80 = math.rsqrt %79 : vector<1x8xf32>
    %81 = arith.mulf %77, %80 : vector<1x8xf32>
    %c0_53 = arith.constant 0 : index
    %c0_54 = arith.constant 0 : index
    %82 = vector.load %arg8[%c0_53, %c0_54] : memref<1x8xf32, #tpu.memory_space<vmem>>, vector<1x8xf32>
    %83 = arith.mulf %62, %81 : vector<1x8xf32>
    %84 = arith.subf %82, %83 : vector<1x8xf32>
    %cst_55 = arith.constant 0.000000e+00 : f32
    %85 = vector.broadcast %cst_55 : f32 to vector<8x8xf32>
    %cst_56 = arith.constant 0.000000e+00 : f32
    %86 = vector.broadcast %cst_56 : f32 to vector<8x8xf32>
    %c0_i32_57 = arith.constant 0 : i32
    %c2_i32_58 = arith.constant 2 : i32
    %87 = arith.addi %c0_i32_57, %c2_i32_58 : i32
    %c1_i32_59 = arith.constant 1 : i32
    scf.for %arg24 = %c0_i32_57 to %87 step %c1_i32_59  : i32 {
      %c1_i32_168 = arith.constant 1 : i32
      %232 = arith.muli %arg24, %c1_i32_168 : i32
      %c0_i32_169 = arith.constant 0 : i32
      %233 = arith.addi %c0_i32_169, %232 : i32
      %c32_i32 = arith.constant 32 : i32
      %234 = arith.muli %233, %c32_i32 : i32
      %235 = tpu.assume_multiple %234, 8 : i32
      %c24_i32 = arith.constant 24 : i32
      %236 = arith.muli %233, %c24_i32 : i32
      %237 = tpu.assume_multiple %236, 8 : i32
      %c7_i32 = arith.constant 7 : i32
      %238 = arith.addi %235, %c7_i32 : i32
      %239 = arith.index_cast %238 : i32 to index
      %c0_170 = arith.constant 0 : index
      %240 = tpu.strided_load %arg21[%239, %c0_170] {strides = array<i32: 2, 1>} : memref<64x11xf32, #tpu.memory_space<vmem>>, vector<8x8xf32>
      %c1_i32_171 = arith.constant 1 : i32
      %241 = arith.addi %238, %c1_i32_171 : i32
      %242 = arith.index_cast %241 : i32 to index
      %c0_172 = arith.constant 0 : index
      %243 = tpu.strided_load %arg21[%242, %c0_172] {strides = array<i32: 2, 1>} : memref<64x11xf32, #tpu.memory_space<vmem>>, vector<8x8xf32>
      %244 = vector.broadcast %81 : vector<1x8xf32> to vector<8x8xf32>
      %245 = arith.mulf %240, %244 : vector<8x8xf32>
      %246 = vector.broadcast %84 : vector<1x8xf32> to vector<8x8xf32>
      %247 = arith.addf %245, %246 : vector<8x8xf32>
      %248 = vector.broadcast %81 : vector<1x8xf32> to vector<8x8xf32>
      %249 = arith.mulf %243, %248 : vector<8x8xf32>
      %250 = vector.broadcast %84 : vector<1x8xf32> to vector<8x8xf32>
      %251 = arith.addf %249, %250 : vector<8x8xf32>
      %252 = arith.maximumf %247, %251 : vector<8x8xf32>
      %cst_173 = arith.constant 0.000000e+00 : f32
      %253 = vector.broadcast %cst_173 : f32 to vector<8x8xf32>
      %254 = arith.maximumf %252, %253 : vector<8x8xf32>
      %255 = arith.index_cast %237 : i32 to index
      %c0_174 = arith.constant 0 : index
      %256 = vector.load %arg23[%255, %c0_174] : memref<48x11xf32, #tpu.memory_space<vmem>>, vector<8x8xf32>
      tpu.vector_store %arg23[%255, %c0_174], %85 {strides = array<i32>} : memref<48x11xf32, #tpu.memory_space<vmem>>, vector<8x8xf32>,
      %c8_i32 = arith.constant 8 : i32
      %257 = arith.addi %237, %c8_i32 : i32
      %c8_i32_175 = arith.constant 8 : i32
      %258 = arith.addi %257, %c8_i32_175 : i32
      %259 = arith.index_cast %258 : i32 to index
      %c0_176 = arith.constant 0 : index
      %260 = vector.load %arg23[%259, %c0_176] : memref<48x11xf32, #tpu.memory_space<vmem>>, vector<8x8xf32>
      tpu.vector_store %arg23[%259, %c0_176], %86 {strides = array<i32>} : memref<48x11xf32, #tpu.memory_space<vmem>>, vector<8x8xf32>,
      %c8_i32_177 = arith.constant 8 : i32
      %261 = arith.addi %237, %c8_i32_177 : i32
      %262 = tpu.assume_multiple %261, 8 : i32
      %263 = arith.index_cast %262 : i32 to index
      %c0_178 = arith.constant 0 : index
      %264 = vector.load %arg23[%263, %c0_178] : memref<48x11xf32, #tpu.memory_space<vmem>>, vector<8x8xf32>
      tpu.vector_store %arg23[%263, %c0_178], %254 {strides = array<i32>} : memref<48x11xf32, #tpu.memory_space<vmem>>, vector<8x8xf32>,
    }
    %c2_i32_60 = arith.constant 2 : i32
    %c0_61 = arith.constant 0 : index
    %c0_62 = arith.constant 0 : index
    %88 = vector.load %arg23[%c0_61, %c0_62] : memref<48x11xf32, #tpu.memory_space<vmem>>, vector<46x8xf32>
    %c1_63 = arith.constant 1 : index
    %c0_64 = arith.constant 0 : index
    %89 = vector.load %arg23[%c1_63, %c0_64] : memref<48x11xf32, #tpu.memory_space<vmem>>, vector<46x8xf32>
    %c2_65 = arith.constant 2 : index
    %c0_66 = arith.constant 0 : index
    %90 = vector.load %arg23[%c2_65, %c0_66] : memref<48x11xf32, #tpu.memory_space<vmem>>, vector<46x8xf32>
    %91 = tpu.concatenate %88, %89, %90 in 1 : vector<46x8xf32>, vector<46x8xf32>, vector<46x8xf32> -> vector<46x24xf32>
    %92 = arith.truncf %91 : vector<46x24xf32> to vector<46x24xbf16>
    %c0_67 = arith.constant 0 : index
    %c0_68 = arith.constant 0 : index
    %93 = vector.load %arg9[%c0_67, %c0_68] : memref<24x8xbf16, #tpu.memory_space<vmem>>, vector<24x8xbf16>
    %cst_69 = arith.constant dense<0.000000e+00> : vector<46x8xf32>
    %94 = tpu.matmul %92, %93, %cst_69 {dimension_numbers = #tpu.dot_dimension_numbers<[1], [0], [0], [1], [0, 0, 1, 1], [], []>} : vector<46x24xbf16>, vector<24x8xbf16>, vector<46x8xf32> -> vector<46x8xf32>
    %c0_70 = arith.constant 0 : index
    %c0_71 = arith.constant 0 : index
    %95 = vector.load %arg21[%c0_70, %c0_71] : memref<64x11xf32, #tpu.memory_space<vmem>>, vector<46x8xf32>
    tpu.vector_store %arg21[%c0_70, %c0_71], %94 {strides = array<i32>} : memref<64x11xf32, #tpu.memory_space<vmem>>, vector<46x8xf32>,
    %c0_72 = arith.constant 0 : index
    %c2_73 = arith.constant 2 : index
    %96 = vector.load %arg1[%c0_72, %c2_73] : memref<62x5xf32, #tpu.memory_space<vmem>>, vector<46x1xf32>
    %cst_74 = arith.constant 0.000000e+00 : f32
    %97 = vector.broadcast %cst_74 : f32 to vector<46x1xf32>
    %98 = arith.cmpf ogt, %96, %97 : vector<46x1xf32>
    %cst_75 = arith.constant 0.000000e+00 : f32
    %99 = vector.shape_cast %98 : vector<46x1xi1> to vector<46x1xi1>
    %100 = vector.broadcast %99 : vector<46x1xi1> to vector<46x8xi1>
    %101 = vector.broadcast %cst_75 : f32 to vector<46x8xf32>
    %102 = arith.select %100, %94, %101 : vector<46x8xi1>, vector<46x8xf32>
    %cst_76 = arith.constant dense<0.000000e+00> : vector<8xf32>
    %103 = vector.multi_reduction <add>, %102, %cst_76 [0] : vector<46x8xf32> to vector<8xf32>
    %104 = vector.shape_cast %103 : vector<8xf32> to vector<1x8xf32>
    %cst_77 = arith.constant 6.250000e-02 : f32
    %105 = vector.broadcast %cst_77 : f32 to vector<1x8xf32>
    %106 = arith.mulf %104, %105 : vector<1x8xf32>
    %cst_78 = arith.constant 0.000000e+00 : f32
    %107 = vector.broadcast %cst_78 : f32 to vector<46x1xf32>
    %108 = arith.cmpf ogt, %96, %107 : vector<46x1xf32>
    %c0_79 = arith.constant 0 : index
    %c0_80 = arith.constant 0 : index
    %109 = vector.load %arg21[%c0_79, %c0_80] : memref<64x11xf32, #tpu.memory_space<vmem>>, vector<46x8xf32>
    %110 = vector.broadcast %106 : vector<1x8xf32> to vector<46x8xf32>
    %111 = arith.subf %109, %110 : vector<46x8xf32>
    %cst_81 = arith.constant 0.000000e+00 : f32
    %112 = vector.shape_cast %108 : vector<46x1xi1> to vector<46x1xi1>
    %113 = vector.broadcast %112 : vector<46x1xi1> to vector<46x8xi1>
    %114 = vector.broadcast %cst_81 : f32 to vector<46x8xf32>
    %115 = arith.select %113, %111, %114 : vector<46x8xi1>, vector<46x8xf32>
    %116 = arith.mulf %115, %115 : vector<46x8xf32>
    %cst_82 = arith.constant dense<0.000000e+00> : vector<8xf32>
    %117 = vector.multi_reduction <add>, %116, %cst_82 [0] : vector<46x8xf32> to vector<8xf32>
    %118 = vector.shape_cast %117 : vector<8xf32> to vector<1x8xf32>
    %cst_83 = arith.constant 6.250000e-02 : f32
    %119 = vector.broadcast %cst_83 : f32 to vector<1x8xf32>
    %120 = arith.mulf %118, %119 : vector<1x8xf32>
    %c0_84 = arith.constant 0 : index
    %c0_85 = arith.constant 0 : index
    %121 = vector.load %arg10[%c0_84, %c0_85] : memref<1x8xf32, #tpu.memory_space<vmem>>, vector<1x8xf32>
    %cst_86 = arith.constant 9.99999974E-6 : f32
    %122 = vector.broadcast %cst_86 : f32 to vector<1x8xf32>
    %123 = arith.addf %120, %122 : vector<1x8xf32>
    %124 = math.rsqrt %123 : vector<1x8xf32>
    %125 = arith.mulf %121, %124 : vector<1x8xf32>
    %c0_87 = arith.constant 0 : index
    %c0_88 = arith.constant 0 : index
    %126 = vector.load %arg11[%c0_87, %c0_88] : memref<1x8xf32, #tpu.memory_space<vmem>>, vector<1x8xf32>
    %127 = arith.mulf %106, %125 : vector<1x8xf32>
    %128 = arith.subf %126, %127 : vector<1x8xf32>
    %cst_89 = arith.constant 0.000000e+00 : f32
    %129 = vector.broadcast %cst_89 : f32 to vector<8x8xf32>
    %cst_90 = arith.constant 0.000000e+00 : f32
    %130 = vector.broadcast %cst_90 : f32 to vector<8x8xf32>
    %c0_i32_91 = arith.constant 0 : i32
    %c2_i32_92 = arith.constant 2 : i32
    %131 = arith.addi %c0_i32_91, %c2_i32_92 : i32
    %c1_i32_93 = arith.constant 1 : i32
    scf.for %arg24 = %c0_i32_91 to %131 step %c1_i32_93  : i32 {
      %c1_i32_168 = arith.constant 1 : i32
      %232 = arith.muli %arg24, %c1_i32_168 : i32
      %c0_i32_169 = arith.constant 0 : i32
      %233 = arith.addi %c0_i32_169, %232 : i32
      %c24_i32 = arith.constant 24 : i32
      %234 = arith.muli %233, %c24_i32 : i32
      %235 = tpu.assume_multiple %234, 8 : i32
      %c24_i32_170 = arith.constant 24 : i32
      %236 = arith.muli %233, %c24_i32_170 : i32
      %237 = tpu.assume_multiple %236, 8 : i32
      %c7_i32 = arith.constant 7 : i32
      %238 = arith.addi %235, %c7_i32 : i32
      %239 = arith.index_cast %238 : i32 to index
      %c0_171 = arith.constant 0 : index
      %240 = vector.load %arg21[%239, %c0_171] : memref<64x11xf32, #tpu.memory_space<vmem>>, vector<8x8xf32>
      %241 = vector.broadcast %125 : vector<1x8xf32> to vector<8x8xf32>
      %242 = arith.mulf %240, %241 : vector<8x8xf32>
      %243 = vector.broadcast %128 : vector<1x8xf32> to vector<8x8xf32>
      %244 = arith.addf %242, %243 : vector<8x8xf32>
      %cst_172 = arith.constant 0.000000e+00 : f32
      %245 = vector.broadcast %cst_172 : f32 to vector<8x8xf32>
      %246 = arith.maximumf %244, %245 : vector<8x8xf32>
      %247 = arith.index_cast %237 : i32 to index
      %c0_173 = arith.constant 0 : index
      %248 = vector.load %arg22[%247, %c0_173] : memref<64x8xf32, #tpu.memory_space<vmem>>, vector<8x8xf32>
      tpu.vector_store %arg22[%247, %c0_173], %129 {strides = array<i32>} : memref<64x8xf32, #tpu.memory_space<vmem>>, vector<8x8xf32>,
      %c8_i32 = arith.constant 8 : i32
      %249 = arith.addi %237, %c8_i32 : i32
      %c8_i32_174 = arith.constant 8 : i32
      %250 = arith.addi %249, %c8_i32_174 : i32
      %251 = arith.index_cast %250 : i32 to index
      %c0_175 = arith.constant 0 : index
      %252 = vector.load %arg22[%251, %c0_175] : memref<64x8xf32, #tpu.memory_space<vmem>>, vector<8x8xf32>
      tpu.vector_store %arg22[%251, %c0_175], %130 {strides = array<i32>} : memref<64x8xf32, #tpu.memory_space<vmem>>, vector<8x8xf32>,
      %c8_i32_176 = arith.constant 8 : i32
      %253 = arith.addi %237, %c8_i32_176 : i32
      %254 = tpu.assume_multiple %253, 8 : i32
      %255 = arith.index_cast %254 : i32 to index
      %c0_177 = arith.constant 0 : index
      %256 = vector.load %arg22[%255, %c0_177] : memref<64x8xf32, #tpu.memory_space<vmem>>, vector<8x8xf32>
      tpu.vector_store %arg22[%255, %c0_177], %246 {strides = array<i32>} : memref<64x8xf32, #tpu.memory_space<vmem>>, vector<8x8xf32>,
    }
    %c2_i32_94 = arith.constant 2 : i32
    %c0_95 = arith.constant 0 : index
    %c0_96 = arith.constant 0 : index
    %132 = vector.load %arg22[%c0_95, %c0_96] : memref<64x8xf32, #tpu.memory_space<vmem>>, vector<46x8xf32>
    %c1_97 = arith.constant 1 : index
    %c0_98 = arith.constant 0 : index
    %133 = vector.load %arg22[%c1_97, %c0_98] : memref<64x8xf32, #tpu.memory_space<vmem>>, vector<46x8xf32>
    %c2_99 = arith.constant 2 : index
    %c0_100 = arith.constant 0 : index
    %134 = vector.load %arg22[%c2_99, %c0_100] : memref<64x8xf32, #tpu.memory_space<vmem>>, vector<46x8xf32>
    %135 = tpu.concatenate %132, %133, %134 in 1 : vector<46x8xf32>, vector<46x8xf32>, vector<46x8xf32> -> vector<46x24xf32>
    %136 = arith.truncf %135 : vector<46x24xf32> to vector<46x24xbf16>
    %c0_101 = arith.constant 0 : index
    %c0_102 = arith.constant 0 : index
    %137 = vector.load %arg12[%c0_101, %c0_102] : memref<24x11xbf16, #tpu.memory_space<vmem>>, vector<24x11xbf16>
    %cst_103 = arith.constant dense<0.000000e+00> : vector<46x11xf32>
    %138 = tpu.matmul %136, %137, %cst_103 {dimension_numbers = #tpu.dot_dimension_numbers<[1], [0], [0], [1], [0, 0, 1, 1], [], []>} : vector<46x24xbf16>, vector<24x11xbf16>, vector<46x11xf32> -> vector<46x11xf32>
    %c0_104 = arith.constant 0 : index
    %c0_105 = arith.constant 0 : index
    %139 = vector.load %arg21[%c0_104, %c0_105] : memref<64x11xf32, #tpu.memory_space<vmem>>, vector<46x11xf32>
    tpu.vector_store %arg21[%c0_104, %c0_105], %138 {strides = array<i32>} : memref<64x11xf32, #tpu.memory_space<vmem>>, vector<46x11xf32>,
    %c0_106 = arith.constant 0 : index
    %c3 = arith.constant 3 : index
    %140 = vector.load %arg1[%c0_106, %c3] : memref<62x5xf32, #tpu.memory_space<vmem>>, vector<46x1xf32>
    %cst_107 = arith.constant 0.000000e+00 : f32
    %141 = vector.broadcast %cst_107 : f32 to vector<46x1xf32>
    %142 = arith.cmpf ogt, %140, %141 : vector<46x1xf32>
    %cst_108 = arith.constant 0.000000e+00 : f32
    %143 = vector.shape_cast %142 : vector<46x1xi1> to vector<46x1xi1>
    %144 = vector.broadcast %143 : vector<46x1xi1> to vector<46x11xi1>
    %145 = vector.broadcast %cst_108 : f32 to vector<46x11xf32>
    %146 = arith.select %144, %138, %145 : vector<46x11xi1>, vector<46x11xf32>
    %cst_109 = arith.constant dense<0.000000e+00> : vector<11xf32>
    %147 = vector.multi_reduction <add>, %146, %cst_109 [0] : vector<46x11xf32> to vector<11xf32>
    %148 = vector.shape_cast %147 : vector<11xf32> to vector<1x11xf32>
    %cst_110 = arith.constant 6.250000e-02 : f32
    %149 = vector.broadcast %cst_110 : f32 to vector<1x11xf32>
    %150 = arith.mulf %148, %149 : vector<1x11xf32>
    %cst_111 = arith.constant 0.000000e+00 : f32
    %151 = vector.broadcast %cst_111 : f32 to vector<46x1xf32>
    %152 = arith.cmpf ogt, %140, %151 : vector<46x1xf32>
    %c0_112 = arith.constant 0 : index
    %c0_113 = arith.constant 0 : index
    %153 = vector.load %arg21[%c0_112, %c0_113] : memref<64x11xf32, #tpu.memory_space<vmem>>, vector<46x11xf32>
    %154 = vector.broadcast %150 : vector<1x11xf32> to vector<46x11xf32>
    %155 = arith.subf %153, %154 : vector<46x11xf32>
    %cst_114 = arith.constant 0.000000e+00 : f32
    %156 = vector.shape_cast %152 : vector<46x1xi1> to vector<46x1xi1>
    %157 = vector.broadcast %156 : vector<46x1xi1> to vector<46x11xi1>
    %158 = vector.broadcast %cst_114 : f32 to vector<46x11xf32>
    %159 = arith.select %157, %155, %158 : vector<46x11xi1>, vector<46x11xf32>
    %160 = arith.mulf %159, %159 : vector<46x11xf32>
    %cst_115 = arith.constant dense<0.000000e+00> : vector<11xf32>
    %161 = vector.multi_reduction <add>, %160, %cst_115 [0] : vector<46x11xf32> to vector<11xf32>
    %162 = vector.shape_cast %161 : vector<11xf32> to vector<1x11xf32>
    %cst_116 = arith.constant 6.250000e-02 : f32
    %163 = vector.broadcast %cst_116 : f32 to vector<1x11xf32>
    %164 = arith.mulf %162, %163 : vector<1x11xf32>
    %c0_117 = arith.constant 0 : index
    %c0_118 = arith.constant 0 : index
    %165 = vector.load %arg13[%c0_117, %c0_118] : memref<1x11xf32, #tpu.memory_space<vmem>>, vector<1x11xf32>
    %cst_119 = arith.constant 9.99999974E-6 : f32
    %166 = vector.broadcast %cst_119 : f32 to vector<1x11xf32>
    %167 = arith.addf %164, %166 : vector<1x11xf32>
    %168 = math.rsqrt %167 : vector<1x11xf32>
    %169 = arith.mulf %165, %168 : vector<1x11xf32>
    %c0_120 = arith.constant 0 : index
    %c0_121 = arith.constant 0 : index
    %170 = vector.load %arg14[%c0_120, %c0_121] : memref<1x11xf32, #tpu.memory_space<vmem>>, vector<1x11xf32>
    %171 = arith.mulf %150, %169 : vector<1x11xf32>
    %172 = arith.subf %170, %171 : vector<1x11xf32>
    %cst_122 = arith.constant 0.000000e+00 : f32
    %173 = vector.broadcast %cst_122 : f32 to vector<8x11xf32>
    %cst_123 = arith.constant 0.000000e+00 : f32
    %174 = vector.broadcast %cst_123 : f32 to vector<4x11xf32>
    %c0_i32_124 = arith.constant 0 : i32
    %c2_i32_125 = arith.constant 2 : i32
    %175 = arith.addi %c0_i32_124, %c2_i32_125 : i32
    %c1_i32_126 = arith.constant 1 : i32
    scf.for %arg24 = %c0_i32_124 to %175 step %c1_i32_126  : i32 {
      %c1_i32_168 = arith.constant 1 : i32
      %232 = arith.muli %arg24, %c1_i32_168 : i32
      %c0_i32_169 = arith.constant 0 : i32
      %233 = arith.addi %c0_i32_169, %232 : i32
      %c24_i32 = arith.constant 24 : i32
      %234 = arith.muli %233, %c24_i32 : i32
      %235 = tpu.assume_multiple %234, 8 : i32
      %c16_i32 = arith.constant 16 : i32
      %236 = arith.muli %233, %c16_i32 : i32
      %237 = tpu.assume_multiple %236, 8 : i32
      %c7_i32 = arith.constant 7 : i32
      %238 = arith.addi %235, %c7_i32 : i32
      %239 = arith.index_cast %238 : i32 to index
      %c0_170 = arith.constant 0 : index
      %240 = tpu.strided_load %arg21[%239, %c0_170] {strides = array<i32: 2, 1>} : memref<64x11xf32, #tpu.memory_space<vmem>>, vector<4x11xf32>
      %c1_i32_171 = arith.constant 1 : i32
      %241 = arith.addi %238, %c1_i32_171 : i32
      %242 = arith.index_cast %241 : i32 to index
      %c0_172 = arith.constant 0 : index
      %243 = tpu.strided_load %arg21[%242, %c0_172] {strides = array<i32: 2, 1>} : memref<64x11xf32, #tpu.memory_space<vmem>>, vector<4x11xf32>
      %244 = vector.broadcast %169 : vector<1x11xf32> to vector<4x11xf32>
      %245 = arith.mulf %240, %244 : vector<4x11xf32>
      %246 = vector.broadcast %172 : vector<1x11xf32> to vector<4x11xf32>
      %247 = arith.addf %245, %246 : vector<4x11xf32>
      %248 = vector.broadcast %169 : vector<1x11xf32> to vector<4x11xf32>
      %249 = arith.mulf %243, %248 : vector<4x11xf32>
      %250 = vector.broadcast %172 : vector<1x11xf32> to vector<4x11xf32>
      %251 = arith.addf %249, %250 : vector<4x11xf32>
      %252 = arith.maximumf %247, %251 : vector<4x11xf32>
      %cst_173 = arith.constant 0.000000e+00 : f32
      %253 = vector.broadcast %cst_173 : f32 to vector<4x11xf32>
      %254 = arith.maximumf %252, %253 : vector<4x11xf32>
      %255 = arith.index_cast %237 : i32 to index
      %c0_174 = arith.constant 0 : index
      %256 = vector.load %arg23[%255, %c0_174] : memref<48x11xf32, #tpu.memory_space<vmem>>, vector<8x11xf32>
      tpu.vector_store %arg23[%255, %c0_174], %173 {strides = array<i32>} : memref<48x11xf32, #tpu.memory_space<vmem>>, vector<8x11xf32>,
      %c8_i32 = arith.constant 8 : i32
      %257 = arith.addi %237, %c8_i32 : i32
      %c4_i32 = arith.constant 4 : i32
      %258 = arith.addi %257, %c4_i32 : i32
      %259 = arith.index_cast %258 : i32 to index
      %c0_175 = arith.constant 0 : index
      %260 = vector.load %arg23[%259, %c0_175] : memref<48x11xf32, #tpu.memory_space<vmem>>, vector<4x11xf32>
      tpu.vector_store %arg23[%259, %c0_175], %174 {strides = array<i32>} : memref<48x11xf32, #tpu.memory_space<vmem>>, vector<4x11xf32>,
      %c8_i32_176 = arith.constant 8 : i32
      %261 = arith.addi %237, %c8_i32_176 : i32
      %262 = tpu.assume_multiple %261, 8 : i32
      %263 = arith.index_cast %262 : i32 to index
      %c0_177 = arith.constant 0 : index
      %264 = vector.load %arg23[%263, %c0_177] : memref<48x11xf32, #tpu.memory_space<vmem>>, vector<4x11xf32>
      tpu.vector_store %arg23[%263, %c0_177], %254 {strides = array<i32>} : memref<48x11xf32, #tpu.memory_space<vmem>>, vector<4x11xf32>,
    }
    %c2_i32_127 = arith.constant 2 : i32
    %c0_128 = arith.constant 0 : index
    %c0_129 = arith.constant 0 : index
    %176 = vector.load %arg23[%c0_128, %c0_129] : memref<48x11xf32, #tpu.memory_space<vmem>>, vector<30x11xf32>
    %c1_130 = arith.constant 1 : index
    %c0_131 = arith.constant 0 : index
    %177 = vector.load %arg23[%c1_130, %c0_131] : memref<48x11xf32, #tpu.memory_space<vmem>>, vector<30x11xf32>
    %c2_132 = arith.constant 2 : index
    %c0_133 = arith.constant 0 : index
    %178 = vector.load %arg23[%c2_132, %c0_133] : memref<48x11xf32, #tpu.memory_space<vmem>>, vector<30x11xf32>
    %179 = tpu.concatenate %176, %177, %178 in 1 : vector<30x11xf32>, vector<30x11xf32>, vector<30x11xf32> -> vector<30x33xf32>
    %180 = arith.truncf %179 : vector<30x33xf32> to vector<30x33xbf16>
    %c0_134 = arith.constant 0 : index
    %c0_135 = arith.constant 0 : index
    %181 = vector.load %arg15[%c0_134, %c0_135] : memref<33x11xbf16, #tpu.memory_space<vmem>>, vector<33x11xbf16>
    %cst_136 = arith.constant dense<0.000000e+00> : vector<30x11xf32>
    %182 = tpu.matmul %180, %181, %cst_136 {dimension_numbers = #tpu.dot_dimension_numbers<[1], [0], [0], [1], [0, 0, 1, 1], [], []>} : vector<30x33xbf16>, vector<33x11xbf16>, vector<30x11xf32> -> vector<30x11xf32>
    %c0_137 = arith.constant 0 : index
    %c0_138 = arith.constant 0 : index
    %183 = vector.load %arg21[%c0_137, %c0_138] : memref<64x11xf32, #tpu.memory_space<vmem>>, vector<30x11xf32>
    tpu.vector_store %arg21[%c0_137, %c0_138], %182 {strides = array<i32>} : memref<64x11xf32, #tpu.memory_space<vmem>>, vector<30x11xf32>,
    %c0_139 = arith.constant 0 : index
    %c4 = arith.constant 4 : index
    %184 = vector.load %arg1[%c0_139, %c4] : memref<62x5xf32, #tpu.memory_space<vmem>>, vector<30x1xf32>
    %cst_140 = arith.constant 0.000000e+00 : f32
    %185 = vector.broadcast %cst_140 : f32 to vector<30x1xf32>
    %186 = arith.cmpf ogt, %184, %185 : vector<30x1xf32>
    %cst_141 = arith.constant 0.000000e+00 : f32
    %187 = vector.shape_cast %186 : vector<30x1xi1> to vector<30x1xi1>
    %188 = vector.broadcast %187 : vector<30x1xi1> to vector<30x11xi1>
    %189 = vector.broadcast %cst_141 : f32 to vector<30x11xf32>
    %190 = arith.select %188, %182, %189 : vector<30x11xi1>, vector<30x11xf32>
    %cst_142 = arith.constant dense<0.000000e+00> : vector<11xf32>
    %191 = vector.multi_reduction <add>, %190, %cst_142 [0] : vector<30x11xf32> to vector<11xf32>
    %192 = vector.shape_cast %191 : vector<11xf32> to vector<1x11xf32>
    %cst_143 = arith.constant 1.250000e-01 : f32
    %193 = vector.broadcast %cst_143 : f32 to vector<1x11xf32>
    %194 = arith.mulf %192, %193 : vector<1x11xf32>
    %cst_144 = arith.constant 0.000000e+00 : f32
    %195 = vector.broadcast %cst_144 : f32 to vector<30x1xf32>
    %196 = arith.cmpf ogt, %184, %195 : vector<30x1xf32>
    %c0_145 = arith.constant 0 : index
    %c0_146 = arith.constant 0 : index
    %197 = vector.load %arg21[%c0_145, %c0_146] : memref<64x11xf32, #tpu.memory_space<vmem>>, vector<30x11xf32>
    %198 = vector.broadcast %194 : vector<1x11xf32> to vector<30x11xf32>
    %199 = arith.subf %197, %198 : vector<30x11xf32>
    %cst_147 = arith.constant 0.000000e+00 : f32
    %200 = vector.shape_cast %196 : vector<30x1xi1> to vector<30x1xi1>
    %201 = vector.broadcast %200 : vector<30x1xi1> to vector<30x11xi1>
    %202 = vector.broadcast %cst_147 : f32 to vector<30x11xf32>
    %203 = arith.select %201, %199, %202 : vector<30x11xi1>, vector<30x11xf32>
    %204 = arith.mulf %203, %203 : vector<30x11xf32>
    %cst_148 = arith.constant dense<0.000000e+00> : vector<11xf32>
    %205 = vector.multi_reduction <add>, %204, %cst_148 [0] : vector<30x11xf32> to vector<11xf32>
    %206 = vector.shape_cast %205 : vector<11xf32> to vector<1x11xf32>
    %cst_149 = arith.constant 1.250000e-01 : f32
    %207 = vector.broadcast %cst_149 : f32 to vector<1x11xf32>
    %208 = arith.mulf %206, %207 : vector<1x11xf32>
    %c0_150 = arith.constant 0 : index
    %c0_151 = arith.constant 0 : index
    %209 = vector.load %arg16[%c0_150, %c0_151] : memref<1x11xf32, #tpu.memory_space<vmem>>, vector<1x11xf32>
    %cst_152 = arith.constant 9.99999974E-6 : f32
    %210 = vector.broadcast %cst_152 : f32 to vector<1x11xf32>
    %211 = arith.addf %208, %210 : vector<1x11xf32>
    %212 = math.rsqrt %211 : vector<1x11xf32>
    %213 = arith.mulf %209, %212 : vector<1x11xf32>
    %c0_153 = arith.constant 0 : index
    %c0_154 = arith.constant 0 : index
    %214 = vector.load %arg17[%c0_153, %c0_154] : memref<1x11xf32, #tpu.memory_space<vmem>>, vector<1x11xf32>
    %215 = arith.mulf %194, %213 : vector<1x11xf32>
    %216 = arith.subf %214, %215 : vector<1x11xf32>
    %c0_155 = arith.constant 0 : index
    %c0_156 = arith.constant 0 : index
    %217 = vector.load %arg21[%c0_155, %c0_156] : memref<64x11xf32, #tpu.memory_space<vmem>>, vector<30x11xf32>
    %218 = vector.broadcast %213 : vector<1x11xf32> to vector<30x11xf32>
    %219 = arith.mulf %217, %218 : vector<30x11xf32>
    %220 = vector.broadcast %216 : vector<1x11xf32> to vector<30x11xf32>
    %221 = arith.addf %219, %220 : vector<30x11xf32>
    %cst_157 = arith.constant 0.000000e+00 : f32
    %222 = vector.broadcast %cst_157 : f32 to vector<30x11xf32>
    %223 = arith.maximumf %221, %222 : vector<30x11xf32>
    %c0_158 = arith.constant 0 : index
    %c0_159 = arith.constant 0 : index
    %224 = vector.load %arg2[%c0_158, %c0_159] : memref<2x30xf32, #tpu.memory_space<vmem>>, vector<2x30xf32>
    %cst_160 = arith.constant dense<0.000000e+00> : vector<2x11xf32>
    %225 = tpu.matmul %224, %223, %cst_160 {dimension_numbers = #tpu.dot_dimension_numbers<[1], [0], [0], [1], [0, 0, 1, 1], [], []>} : vector<2x30xf32>, vector<30x11xf32>, vector<2x11xf32> -> vector<2x11xf32>
    %c0_161 = arith.constant 0 : index
    %c0_162 = arith.constant 0 : index
    %226 = vector.load %arg18[%c0_161, %c0_162] : memref<11x5xf32, #tpu.memory_space<vmem>>, vector<11x5xf32>
    %cst_163 = arith.constant dense<0.000000e+00> : vector<2x5xf32>
    %227 = tpu.matmul %225, %226, %cst_163 {dimension_numbers = #tpu.dot_dimension_numbers<[1], [0], [0], [1], [0, 0, 1, 1], [], []>} : vector<2x11xf32>, vector<11x5xf32>, vector<2x5xf32> -> vector<2x5xf32>
    %c0_164 = arith.constant 0 : index
    %c0_165 = arith.constant 0 : index
    %228 = vector.load %arg19[%c0_164, %c0_165] : memref<1x5xf32, #tpu.memory_space<vmem>>, vector<1x5xf32>
    %229 = vector.broadcast %228 : vector<1x5xf32> to vector<2x5xf32>
    %230 = arith.addf %227, %229 : vector<2x5xf32>
    %c0_166 = arith.constant 0 : index
    %c0_167 = arith.constant 0 : index
    %231 = vector.load %arg20[%c0_166, %c0_167] : memref<2x5xf32, #tpu.memory_space<vmem>>, vector<2x5xf32>
    tpu.vector_store %arg20[%c0_166, %c0_167], %230 {strides = array<i32>} : memref<2x5xf32, #tpu.memory_space<vmem>>, vector<2x5xf32>,
    return
  }
}

</mosaic_0001>

<bundles_post_ra>
// kernel: tpu_custom_call.1
= control target key start
LH: loop header
LB: loop body
LE: loop exit
PB: predicated region body
PF: predicated region fallthrough
CT: control target
= control target key end

     0   :  { %s3311_s0 = inlined_call_operand.vmem [shape: f32[64,4], index: 0, kind: input, shape index: {}]   ;;  %s3312_s1 = inlined_call_operand.vmem [shape: f32[62,5], index: 1, kind: input, shape index: {}]   ;;  %s3313_s2 = inlined_call_operand.vmem [shape: f32[2,30], index: 2, kind: input, shape index: {}]   ;;  %s3314_s3 = inlined_call_operand.vmem [shape: bf16[12,8], index: 3, kind: input, shape index: {}]   ;;  %s3315_s4 = inlined_call_operand.vmem [shape: f32[1,8], index: 4, kind: input, shape index: {}]   ;;  %s3316_s5 = inlined_call_operand.vmem [shape: f32[1,8], index: 5, kind: input, shape index: {}]   ;;  %s3317_s6 = inlined_call_operand.vmem [shape: bf16[24,8], index: 6, kind: input, shape index: {}]   ;;  %s3318_s7 = inlined_call_operand.vmem [shape: f32[1,8], index: 7, kind: input, shape index: {}]   ;;  %s3319_s8 = inlined_call_operand.vmem [shape: f32[1,8], index: 8, kind: input, shape index: {}]   ;;  %s3320_s9 = inlined_call_operand.vmem [shape: bf16[24,8], index: 9, kind: input, shape index: {}]   ;;  %s3321_s10 = inlined_call_operand.vmem [shape: f32[1,8], index: 10, kind: input, shape index: {}]   ;;  %s3322_s11 = inlined_call_operand.vmem [shape: f32[1,8], index: 11, kind: input, shape index: {}]   ;;  %s3323_s12 = inlined_call_operand.vmem [shape: bf16[24,11], index: 12, kind: input, shape index: {}]   ;;  %s3324_s13 = inlined_call_operand.vmem [shape: f32[1,11], index: 13, kind: input, shape index: {}]   ;;  %s3325_s14 = inlined_call_operand.vmem [shape: f32[1,11], index: 14, kind: input, shape index: {}]   ;;  %s3326_s15 = inlined_call_operand.vmem [shape: bf16[33,11], index: 15, kind: input, shape index: {}]   ;;  %s3327_s16 = inlined_call_operand.vmem [shape: f32[1,11], index: 16, kind: input, shape index: {}]   ;;  %s3328_s17 = inlined_call_operand.vmem [shape: f32[1,11], index: 17, kind: input, shape index: {}]   ;;  %s3329_s18 = inlined_call_operand.vmem [shape: f32[11,5], index: 18, kind: input, shape index: {}]   ;;  %s3330_s19 = inlined_call_operand.vmem [shape: f32[1,5], index: 19, kind: input, shape index: {}]   ;;  %s3331_s20 = inlined_call_operand.hbm [shape: f32[2,5], index: 20, kind: output, shape index: {}]  }
   0x1   :  { %3338 = sst [smem:[#allocation8_spill]] %s3311_s0 }
   0x2   :  { %3339 = sst [smem:[#allocation9_spill]] %s3312_s1 }
   0x3   :  { %3340 = sst [smem:[#allocation10_spill]] %s3313_s2 }
   0x4   :  { %3341 = sst [smem:[#allocation11_spill]] %s3314_s3 }
   0x5   :  { %3342 = sst [smem:[#allocation12_spill]] %s3315_s4 }
   0x6   :  { %s3343_s23 = sld [smem:[#allocation8_spill]]  ;;  %s2480_s24 = smov 8   ;;  %vm197_vm0 = vcmask 1045504  }
   0x7   :  { %s2481_s2 = smov 4  }
   0xc   :  { %v83_v0 = vld [vmem:[%s3343_s23 + $0x2] sm:$0xff]  ;;  %v84_v1 = vld [vmem:[%s3343_s23 + $0xa] sm:$0xff]  ;;  %v85_v5 = vld [vmem:[%s3343_s23 + $0x12] sm:$0xff] }
   0xd   :  { %v75_v2 = vld [vmem:[%s3343_s23 + $0x1] sm:$0xff]  ;;  %v2244_v3 = vpack.i.bf16 %v84_v1, %v83_v0  ;;  %v76_v4 = vld [vmem:[%s3343_s23 + $0x9] sm:$0xff]  ;;  %v77_v8 = vld [vmem:[%s3343_s23 + $0x11] sm:$0xff] }
   0xe   :  { %v86_v6 = vld [vmem:[%s3343_s23 + $0x1a] sm:$0xff]  ;;  %v2234_v7 = vpack.i.bf16 %v76_v4, %v75_v2  ;;  %v81_v12 = vld [vmem:[%s3343_s23 + $0x31] sm:$0xff]  ;;  %v80_v15 = vld [vmem:[%s3343_s23 + $0x29] sm:$0xff] }
   0xf   :  { %v78_v9 = vld [vmem:[%s3343_s23 + $0x19] sm:$0xff]  ;;  %2245 = vrot.lane.b32.xlu1 %v2244_v3, %s2480_s24  ;;  %v2249_v10 = vpack.i.bf16 %v86_v6, %v85_v5  ;;  %v79_v14 = vld [vmem:[%s3343_s23 + $0x21] sm:$0xff] }
  0x10   :  { %2235 = vrot.lane.b32.xlu0 %v2234_v7, %s2481_s2  ;;  %v2239_v11 = vpack.i.bf16 %v78_v9, %v77_v8  ;;  %v82_v13 = vld [vmem:[%s3343_s23 + $0x39] sm:$0x3f] }
  0x11   :  { %25 = vsyncpa [#allocation6], 0  ;;  %v2259_v16 = vpack.i.bf16 %v82_v13, %v81_v12  ;;  %s3344_s1 = sld [smem:[#allocation11_spill]]  ;;  %v2254_v18 = vpack.i.bf16 %v80_v15, %v79_v14  ;;  %v89_v19 = vld [vmem:[%s3343_s23 + $0x32] sm:$0xff]  ;;  %v90_v20 = vld [vmem:[%s3343_s23 + $0x3a] sm:$0x3f] }
  0x12   :  { %v87_v21 = vld [vmem:[%s3343_s23 + $0x22] sm:$0xff]  ;;  %v88_v22 = vld [vmem:[%s3343_s23 + $0x2a] sm:$0xff]  ;;  %v2482_v24 = vmov 0   ;;  %s3345_s21 = sld [smem:[#allocation9_spill]]  ;;  %v2269_v26 = vpack.i.bf16 %v90_v20, %v89_v19  ;;  %vm155_vm9 = vcmask 31744   ;;  %vm164_vm10 = vcmask 64512  }
  0x13   :  { %2250 = vrot.lane.b32.xlu1 %v2249_v10, %s2480_s24  ;;  %2274 = vset.pattern.permute.xlu0 %v2482_v24  ;;  %v2264_v28 = vpack.i.bf16 %v88_v22, %v87_v21  ;;  %v67_v47 = vld [vmem:[%s3343_s23] sm:$0xff]  ;;  %v68_v48 = vld [vmem:[%s3343_s23 + $0x8] sm:$0xff]  ;;  %vm184_vm11 = vcmask 97280   ;;  %v69_v57 = vld [vmem:[%s3343_s23 + $0x10] sm:$0xff]  ;;  %s3346_s27 = sld [smem:[#allocation12_spill]]  ;;  %s2464_s4 = smov 0  }
  0x14   :  { %2240 = vrot.lane.b32.xlu0 %v2239_v11, %s2481_s2  ;;  %2275 = vset.pattern.permute.xlu1 %v2482_v24  ;;  %v70_v58 = vld [vmem:[%s3343_s23 + $0x18] sm:$0xff]  ;;  %v73_v9 = vld [vmem:[%s3343_s23 + $0x30] sm:$0xff]  ;;  %v71_v13 = vld [vmem:[%s3343_s23 + $0x20] sm:$0xff] }
  0x15   :  { %v74_v10 = vld [vmem:[%s3343_s23 + $0x38] sm:$0x3f]  ;;  %v72_v14 = vld [vmem:[%s3343_s23 + $0x28] sm:$0xff] }
  0x17   :  { %v2276_v17 = vld [vmem:[%s3344_s1] sm:$0x3f]   ;;  %2260 = vrot.lane.b32.xlu1 %v2259_v16, %s2481_s2 }
  0x18   :  { %2181 = vmatprep.subr.msk.bf16.mxu0 %vm197_vm0, %v2276_v17  ;;  %v199_v23 = vsel %vm197_vm0, %v2276_v17, 0  ;;  %v276_v25 = vld [vmem:[%s3345_s21 + $0x8] sm:$0xff]  ;;  %v275_v27 = vld [vmem:[%s3345_s21] sm:$0xff]  ;;  %2255 = vrot.lane.b32.xlu0 %v2254_v18, %s2481_s2  ;;  %v277_v29 = vld [vmem:[%s3345_s21 + $0x10] sm:$0xff] }
  0x19   :  { %2089 = vmatpush3.bf16.msra.mxu0 %v199_v23  ;;  %vm284_vm1 = vcmp.gt.f32.partialorder %v276_v25, 0.0  ;;  %vm283_vm2 = vcmp.gt.f32.partialorder %v275_v27, 0.0  ;;  %v278_v30 = vld [vmem:[%s3345_s21 + $0x18] sm:$0xff]  ;;  %vm285_vm3 = vcmp.gt.f32.partialorder %v277_v29, 0.0  ;;  %v279_v33 = vld [vmem:[%s3345_s21 + $0x20] sm:$0xff]  ;;  %v280_v34 = vld [vmem:[%s3345_s21 + $0x28] sm:$0xff] }
  0x1a   :  { %v292_v31 = vsel %vm284_vm1, 1, %v2482_v24  ;;  %v291_v32 = vsel %vm283_vm2, 1, %v2482_v24  ;;  %vm286_vm4 = vcmp.gt.f32.partialorder %v278_v30, 0.0  ;;  %v293_v35 = vsel %vm285_vm3, 1, %v2482_v24  ;;  %v281_v37 = vld [vmem:[%s3345_s21 + $0x30] sm:$0xff] }
  0x1b   :  { %2270 = vrot.lane.b32.xlu1 %v2269_v26, %s2480_s24  ;;  %v294_v36 = vsel %vm286_vm4, 1, %v2482_v24  ;;  %vm287_vm5 = vcmp.gt.f32.partialorder %v279_v33, 0.0  ;;  %vm288_vm6 = vcmp.gt.f32.partialorder %v280_v34, 0.0  ;;  %v282_v38 = vld [vmem:[%s3345_s21 + $0x38] sm:$0x3f]  ;;  %vm289_vm7 = vcmp.gt.f32.partialorder %v281_v37, 0.0 }
  0x1c   :  { %2265 = vrot.lane.b32.xlu0 %v2264_v28, %s2480_s24  ;;  %v295_v39 = vsel %vm287_vm5, 1, %v2482_v24  ;;  %v296_v40 = vsel %vm288_vm6, 1, %v2482_v24  ;;  %vm290_vm8 = vcmp.gt.f32.partialorder %v282_v38, 0.0  ;;  %v297_v41 = vsel %vm289_vm7, 1, %v2482_v24 }
  0x1d   :  { %v298_v42 = vsel %vm290_vm8, 1, %v2482_v24  ;;  %vm273_vm1 = vcmask 62464  }
  0x1f   :  { %303 = vperm.xlu1 %2275, %v292_v31  }
  0x20   :  { %300 = vperm.xlu0 %2274, %v291_v32  }
  0x23   :  { %306 = vperm.xlu1 %2275, %v293_v35  }
  0x24   :  { %309 = vperm.xlu0 %2274, %v294_v36  }
  0x27   :  { %312 = vperm.xlu1 %2275, %v295_v39  }
  0x28   :  { %315 = vperm.xlu0 %2274, %v296_v40  }
  0x2b   :  { %318 = vperm.xlu1 %2275, %v297_v41  }
  0x2c   :  { %321 = vperm.xlu0 %2274, %v298_v42  }
  0x81   :  { %v2246_v43 = vpop.permute.xlu1 %2245 }
  0x82   :  { %v2248_v44 = vunpack.i.h.bf16 %v2246_v43  ;;  %v2247_v45 = vunpack.i.l.bf16 %v2246_v43  ;;  %v2236_v46 = vpop.permute.xlu0 %2235 }
  0x83   :  { %v2238_v49 = vunpack.i.h.bf16 %v2236_v46  ;;  %v2237_v50 = vunpack.i.l.bf16 %v2236_v46 }
  0x85   :  { %v2251_v51 = vpop.permute.xlu1 %2250  ;;  %v156_v52 = vsel %vm155_vm9, %v67_v47, %v2237_v50  ;;  %v157_v53 = vsel %vm155_vm9, %v68_v48, %v2238_v49 }
  0x86   :  { %v2253_v54 = vunpack.i.h.bf16 %v2251_v51  ;;  %v2252_v55 = vunpack.i.l.bf16 %v2251_v51  ;;  %v2241_v56 = vpop.permute.xlu0 %2240  ;;  %v165_v59 = vsel %vm164_vm10, %v156_v52, %v2247_v45  ;;  %v166_v60 = vsel %vm164_vm10, %v157_v53, %v2248_v44 }
  0x87   :  { %v2243_v61 = vunpack.i.h.bf16 %v2241_v56  ;;  %v2242_v62 = vunpack.i.l.bf16 %v2241_v56  ;;  %v173_v63 = vpack.c.bf16 %v166_v60, %v165_v59 }
  0x89   :  { %v158_v0 = vsel %vm155_vm9, %v69_v57, %v2242_v62  ;;  %v159_v1 = vsel %vm155_vm9, %v70_v58, %v2243_v61  ;;  %2090 = vmatprep.mubr.msk.bf16.mxu0 %vm184_vm11, %v173_v63  ;;  %v2261_v2 = vpop.permute.xlu1 %2260 }
  0x8a   :  { %v2256_v3 = vpop.permute.xlu0 %2255  ;;  %v167_v4 = vsel %vm164_vm10, %v158_v0, %v2252_v55  ;;  %v168_v5 = vsel %vm164_vm10, %v159_v1, %v2253_v54  ;;  %v2263_v6 = vunpack.i.h.bf16 %v2261_v2  ;;  %v2262_v7 = vunpack.i.l.bf16 %v2261_v2 }
  0x8b   :  { %v174_v8 = vpack.c.bf16 %v168_v5, %v167_v4  ;;  %v2258_v11 = vunpack.i.h.bf16 %v2256_v3  ;;  %v2257_v12 = vunpack.i.l.bf16 %v2256_v3 }
  0x8c   :  { %v162_v19 = vsel %vm155_vm9, %v73_v9, %v2262_v7  ;;  %v163_v20 = vsel %vm155_vm9, %v74_v10, %v2263_v6 }
  0x8d   :  { %2091 = vmatmul.mubr.msk.bf16.vlgmr.msra.gmra.mrb[0].mxu0 %vm184_vm11, %v174_v8  ;;  %v2271_v15 = vpop.permute.xlu1 %2270  ;;  %v160_v23 = vsel %vm155_vm9, %v71_v13, %v2257_v12  ;;  %v161_v25 = vsel %vm155_vm9, %v72_v14, %v2258_v11 }
  0x8e   :  { %v2273_v16 = vunpack.i.h.bf16 %v2271_v15  ;;  %v2272_v17 = vunpack.i.l.bf16 %v2271_v15  ;;  %v2266_v18 = vpop.permute.xlu0 %2265 }
  0x8f   :  { %v2268_v21 = vunpack.i.h.bf16 %v2266_v18  ;;  %v2267_v22 = vunpack.i.l.bf16 %v2266_v18 }
  0x90   :  { %v171_v26 = vsel %vm164_vm10, %v162_v19, %v2272_v17  ;;  %v172_v27 = vsel %vm164_vm10, %v163_v20, %v2273_v16 }
  0x91   :  { %v176_v28 = vpack.c.bf16 %v172_v27, %v171_v26  ;;  %v169_v29 = vsel %vm164_vm10, %v160_v23, %v2267_v22  ;;  %v170_v30 = vsel %vm164_vm10, %v161_v25, %v2268_v21 }
  0x92   :  { %v175_v31 = vpack.c.bf16 %v170_v30, %v169_v29 }
  0x94   :  { %2094 = vmatprep.mubr.msk.bf16.mxu0 %vm184_vm11, %v175_v31 }
  0x95   :  { %2095 = vmatmul.mubr.msk.bf16.gmra.mrb[4].mxu0 %vm184_vm11, %v176_v28 }
  0x9e   :  { %v2739_v32 = vpop.permute.xlu1 %303 }
  0x9f   :  { %v2741_v33 = vpop.permute.xlu0 %300  ;;  %vm324_vm14 = vcmp.eq.s32.totalorder %v2739_v32, 1 }
  0xa0   :  { %vm323_vm12 = vcmp.eq.s32.totalorder %v2741_v33, 1 }
  0xa2   :  { %v2743_v34 = vpop.permute.xlu1 %306 }
  0xa3   :  { %v2745_v35 = vpop.permute.xlu0 %309  ;;  %vm325_vm13 = vcmp.eq.s32.totalorder %v2743_v34, 1 }
  0xa4   :  { %vm326_vm15 = vcmp.eq.s32.totalorder %v2745_v35, 1 }
  0xa6   :  { %v2750_v38 = vpop.permute.xlu1 %312 }
  0xa7   :  { %v2758_v42 = vpop.permute.xlu0 %315  ;;  %vm327_vm2 = vcmp.eq.s32.totalorder %v2750_v38, 1 }
  0xa8   :  { %vm328_vm3 = vcmp.eq.s32.totalorder %v2758_v42, 1 }
  0xaa   :  { %v2770_v50 = vpop.permute.xlu1 %318 }
  0xab   :  { %v2775_v55 = vpop.permute.xlu0 %321  ;;  %vm329_vm4 = vcmp.eq.s32.totalorder %v2770_v50, 1 }
  0xac   :  { %vm330_vm5 = vcmp.eq.s32.totalorder %v2775_v55, 1 }
 0x160   :  { %v2092_v36 = vpop.f32.mrb[0].mxu0 }
 0x161   :  { %268 = vst.msk [vmem:[#allocation2 + $0x10] sm:$0xff] %vm164_vm10, %v2092_v36  ;;  %v235_v37 = vpop.f32.mrb[1].mxu0  ;;  %v333_v43 = vsel %vm325_vm13, %v2092_v36, 0.0 }
 0x162   :  { %266 = vst.msk [vmem:[#allocation2] sm:$0xff] %vm164_vm10, %v235_v37  ;;  %v331_v39 = vsel %vm323_vm12, %v235_v37, 0.0  ;;  %v2093_v40 = vpop.f32.mrb[2].mxu0  ;;  %v342_v49 = vsel %vm164_vm10, %v333_v43, 0.0 }
 0x163   :  { %269 = vst.msk [vmem:[#allocation2 + $0x18] sm:$0xff] %vm164_vm10, %v2093_v40  ;;  %v238_v41 = vpop.f32.mrb[3].mxu0  ;;  %v339_v45 = vsel %vm164_vm10, %v331_v39, 0.0  ;;  %v334_v47 = vsel %vm326_vm15, %v2093_v40, 0.0 }
 0x164   :  { %267 = vst.msk [vmem:[#allocation2 + $0x8] sm:$0xff] %vm164_vm10, %v238_v41  ;;  %v332_v44 = vsel %vm324_vm14, %v238_v41, 0.0  ;;  %v344_v53 = vsel %vm164_vm10, %v334_v47, 0.0 }
 0x165   :  { %v340_v46 = vsel %vm164_vm10, %v332_v44, 0.0 }
 0x166   :  { %v341_v48 = vadd.f32 %v340_v46, %v339_v45 }
 0x168   :  { %v343_v51 = vadd.f32 %v342_v49, %v341_v48  ;;  %v2096_v52 = vpop.f32.mrb[4].mxu0  ;;  %v363_v13 = vld [vmem:[#allocation2 + $0x10] sm:$0xff] }
 0x169   :  { %272 = vst.msk [vmem:[#allocation2 + $0x30] sm:$0xff] %vm164_vm10, %v2096_v52  ;;  %v251_v54 = vpop.f32.mrb[5].mxu0  ;;  %v337_v61 = vsel %vm329_vm4, %v2096_v52, 0.0  ;;  %v361_v15 = vld [vmem:[#allocation2] sm:$0xff] }
 0x16a   :  { %270 = vst.msk [vmem:[#allocation2 + $0x20] sm:$0xff] %vm164_vm10, %v251_v54  ;;  %v335_v56 = vsel %vm327_vm2, %v251_v54, 0.0  ;;  %v345_v57 = vadd.f32 %v344_v53, %v343_v51  ;;  %v2097_v58 = vpop.f32.mrb[6].mxu0  ;;  %v350_v3 = vsel %vm164_vm10, %v337_v61, 0.0  ;;  %v364_v16 = vld [vmem:[#allocation2 + $0x18] sm:$0xff] }
 0x16b   :  { %v346_v59 = vsel %vm164_vm10, %v335_v56, 0.0  ;;  %274 = vst.msk [vmem:[#allocation2 + $0x38] sm:$0x3f] %vm273_vm1, %v2097_v58  ;;  %v254_v60 = vpop.f32.mrb[7].mxu0  ;;  %v338_v1 = vsel %vm330_vm5, %v2097_v58, 0.0  ;;  %v362_v17 = vld [vmem:[#allocation2 + $0x8] sm:$0xff] }
 0x16c   :  { %v347_v62 = vadd.f32 %v346_v59, %v345_v57  ;;  %271 = vst.msk [vmem:[#allocation2 + $0x28] sm:$0xff] %vm164_vm10, %v254_v60  ;;  %v336_v63 = vsel %vm328_vm3, %v254_v60, 0.0  ;;  %v352_v5 = vsel %vm273_vm1, %v338_v1, 0.0 }
 0x16d   :  { %v348_v0 = vsel %vm164_vm10, %v336_v63, 0.0 }
 0x16e   :  { %v349_v2 = vadd.f32 %v348_v0, %v347_v62 }
 0x170   :  { %v351_v4 = vadd.f32 %v350_v3, %v349_v2  ;;  %v367_v31 = vld [vmem:[#allocation2 + $0x30] sm:$0xff] }
 0x171   :  { %v365_v18 = vld [vmem:[#allocation2 + $0x20] sm:$0xff] }
 0x172   :  { %v353_v6 = vadd.f32 %v352_v5, %v351_v4  ;;  %v368_v33 = vld [vmem:[#allocation2 + $0x38] sm:$0x3f] }
 0x173   :  { %v366_v25 = vld [vmem:[#allocation2 + $0x28] sm:$0xff] }
 0x174   :  { %v354_v7 = vrot.slane %v353_v6, 4 }
 0x176   :  { %v355_v8 = vadd.f32 %v354_v7, %v353_v6  ;;  %v415_v6 = vld [vmem:[%s3346_s27] sm:$0x1] }
 0x178   :  { %v356_v9 = vrot.slane %v355_v8, 2 }
 0x17a   :  { %v357_v10 = vadd.f32 %v356_v9, %v355_v8  ;;  %v419_v9 = vld [vmem:[%s3316_s5] sm:$0x1] }
 0x17c   :  { %v358_v11 = vrot.slane %v357_v10, 1 }
 0x17e   :  { %v359_v12 = vadd.f32 %v358_v11, %v357_v10 }
 0x180   :  { %v360_v14 = vmul.f32 0.03125, %v359_v12 }
 0x182   :  { %v369_v19 = vsub.f32 %v361_v15, %v360_v14  ;;  %v370_v20 = vsub.f32 %v362_v17, %v360_v14  ;;  %v371_v21 = vsub.f32 %v363_v13, %v360_v14  ;;  %v372_v22 = vsub.f32 %v364_v16, %v360_v14 }
 0x183   :  { %v373_v23 = vsub.f32 %v365_v18, %v360_v14  ;;  %v374_v29 = vsub.f32 %v366_v25, %v360_v14  ;;  %v375_v40 = vsub.f32 %v367_v31, %v360_v14  ;;  %v376_v34 = vsub.f32 %v368_v33, %v360_v14 }
 0x184   :  { %v377_v26 = vsel %vm323_vm12, %v369_v19, 0.0  ;;  %v378_v27 = vsel %vm324_vm14, %v370_v20, 0.0  ;;  %v379_v28 = vsel %vm325_vm13, %v371_v21, 0.0  ;;  %v380_v30 = vsel %vm326_vm15, %v372_v22, 0.0 }
 0x185   :  { %v385_v36 = vmul.f32 %v377_v26, %v377_v26  ;;  %v386_v37 = vmul.f32 %v378_v27, %v378_v27  ;;  %v387_v39 = vmul.f32 %v379_v28, %v379_v28  ;;  %v381_v41 = vsel %vm327_vm2, %v373_v23, 0.0 }
 0x186   :  { %v388_v43 = vmul.f32 %v380_v30, %v380_v30  ;;  %v382_v45 = vsel %vm328_vm3, %v374_v29, 0.0  ;;  %v389_v46 = vmul.f32 %v381_v41, %v381_v41  ;;  %v383_v48 = vsel %vm329_vm4, %v375_v40, 0.0 }
 0x187   :  { %v393_v32 = vsel %vm164_vm10, %v385_v36, 0.0  ;;  %v394_v44 = vsel %vm164_vm10, %v386_v37, 0.0  ;;  %v396_v47 = vsel %vm164_vm10, %v387_v39, 0.0  ;;  %v390_v38 = vmul.f32 %v382_v45, %v382_v45 }
 0x188   :  { %v395_v35 = vadd.f32 %v394_v44, %v393_v32  ;;  %v398_v51 = vsel %vm164_vm10, %v388_v43, 0.0  ;;  %v384_v52 = vsel %vm330_vm5, %v376_v34, 0.0  ;;  %v391_v54 = vmul.f32 %v383_v48, %v383_v48 }
 0x189   :  { %v400_v56 = vsel %vm164_vm10, %v389_v46, 0.0  ;;  %v392_v57 = vmul.f32 %v384_v52, %v384_v52  ;;  %v402_v58 = vsel %vm164_vm10, %v390_v38, 0.0 }
 0x18a   :  { %v397_v49 = vadd.f32 %v396_v47, %v395_v35  ;;  %v404_v60 = vsel %vm164_vm10, %v391_v54, 0.0 }
 0x18b   :  { %v406_v61 = vsel %vm273_vm1, %v392_v57, 0.0 }
 0x18c   :  { %v399_v53 = vadd.f32 %v398_v51, %v397_v49 }
 0x18e   :  { %v401_v42 = vadd.f32 %v400_v56, %v399_v53 }
 0x190   :  { %v403_v59 = vadd.f32 %v402_v58, %v401_v42 }
 0x192   :  { %v405_v50 = vadd.f32 %v404_v60, %v403_v59 }
 0x194   :  { %v407_v62 = vadd.f32 %v406_v61, %v405_v50 }
 0x196   :  { %v408_v63 = vrot.slane %v407_v62, 4 }
 0x198   :  { %v409_v0 = vadd.f32 %v408_v63, %v407_v62 }
 0x19a   :  { %v410_v1 = vrot.slane %v409_v0, 2 }
 0x19c   :  { %v411_v55 = vadd.f32 %v410_v1, %v409_v0 }
 0x19e   :  { %v412_v2 = vrot.slane %v411_v55, 1 }
 0x1a0   :  { %v413_v3 = vadd.f32 %v412_v2, %v411_v55 }
 0x1a2   :  { %v414_v4 = vmul.f32 0.03125, %v413_v3 }
 0x1a4   :  { %v416_v5 = vadd.f32 1e-05, %v414_v4 }
 0x1a6   :  { %2277 = vrsqrt.f32 %v416_v5 }
 0x1b0   :  { %v2278_v7 = vpop.eup %2277 }
 0x1b1   :  { %v418_v8 = vmul.f32 %v2278_v7, %v415_v6 }
 0x1b3   :  { %v420_v10 = vmul.f32 %v418_v8, %v360_v14 }
 0x1b5   :  { %v421_v11 = vsub.f32 %v419_v9, %v420_v10 }
 0x1b6 LB: > { %v434_v12 = vlaneseq  ;;  %s2003_s29 = sshll.u32 %s2466_s4, 5  ;;  %v2483_v15 = vmov 0.0   ;;  %s427_s4 = sadd.s32 1, %s2466_s4   ;;  %s2466_s4 = sphi %s2464_s4, %s427_s4  }
 0x1b7   : > { %s451_s30 = scalar_lea.vmem [#allocation3], %s2003_s29  ;;  %s1929_s0 = scalar_lea.vmem [#allocation2], %s2003_s29 }
 0x1b8   : > { %v435_v13 = vshrl.u32 %v434_v12, 7  ;;  %452 = vst.msk [vmem:[%s451_s30] sm:$0xff] %vm164_vm10, %v2483_v15  ;;  %2008 = vst.msk [vmem:[%s451_s30 + $0x18] sm:$0xff] %vm164_vm10, %v2483_v15  ;;  %v2005_v17 = vld [vmem:[%s1929_s0 + $0x7] sm:$0xff]  ;;  %v2006_v18 = vld [vmem:[%s1929_s0 + $0xf] sm:$0xff]  ;;  %p424_p0 = scmp.ge.s32.totalorder %s427_s4, 2  }
 0x1b9   :  { %s2484_s5 = smov (%p424_p0), 16   ;;  %v2321_v35 = vld [vmem:[%s3317_s6] sm:$0xff] (%p424_p0)   ;;  %vm594_vm6 = vcmask (%p424_p0), 1043456   ;;  %v2322_v38 = vld [vmem:[%s3317_s6 + $0x8] ss:$0 sps:$4 sm:$0xff] (%p424_p0)   ;;  %v2485_v54 = vmov (%p424_p0), 1  }
 0x1ba   : > { %v2827_v16 = vsub.s32 0, %v435_v13  ;;  %2098 = vmatprep.subr.bf16.mxu1 (%p424_p0), %v2321_v35  ;;  %v596_v53 = vsel (%p424_p0), %vm594_vm6, %v2322_v38, 0  ;;  %2320 = vset.pattern.permute.xlu1 (%p424_p0), %v2485_v54  ;;  %s3347_s26 = sld [smem:[#allocation9_spill]] (%p424_p0)  ;;  %vm556_vm2 = vcmask (%p424_p0), 130048   ;;  %vm581_vm3 = vcmask (%p424_p0), 195584   ;;  %s2468_s28 = smov (%p424_p0), 0  }
 0x1bb   :  { %2099 = vmatpush3.bf16.msra.mxu1 (%p424_p0), %v2321_v35  ;;  %2319 = vset.pattern.permute.xlu0 (%p424_p0), %v2485_v54 }
 0x1bc   : > { %v437_v14 = vrot.slane %v418_v8, %v2827_v16  ;;  %v445_v19 = vrot.slane %v421_v11, %v2827_v16  ;;  %2182 = vmatprep.subr.msk.bf16.mxu1 (%p424_p0), %vm594_vm6, %v2322_v38 }
 0x1be   : > { %v439_v20 = vmul.f32 %v2005_v17, %v437_v14  ;;  %v440_v21 = vmul.f32 %v2006_v18, %v437_v14  ;;  %426 = sbr.rel (!%p424_p0) target bundleno = 438 (0x1b6), region = 146 }
 0x1bf   :  { %2101 = vmatpush3.bf16.msra.mxu1 (%p424_p0), %v596_v53 }
 0x1c0   : > { %v447_v22 = vadd.f32 %v445_v19, %v439_v20  ;;  %v448_v23 = vadd.f32 %v445_v19, %v440_v21  ;;  %v672_v56 = vld [vmem:[%s3347_s26 + $0x8] sm:$0xff] (%p424_p0)  ;;  %v671_v57 = vld [vmem:[%s3347_s26] sm:$0xff] (%p424_p0)  ;;  %v673_v59 = vld [vmem:[%s3347_s26 + $0x10] sm:$0xff] (%p424_p0) }
 0x1c1   :  { %vm680_vm7 = vcmp.gt.f32.partialorder (%p424_p0), %v672_v56, 0.0  ;;  %vm679_vm8 = vcmp.gt.f32.partialorder (%p424_p0), %v671_v57, 0.0  ;;  %v674_v60 = vld [vmem:[%s3347_s26 + $0x18] sm:$0xff] (%p424_p0)  ;;  %vm681_vm9 = vcmp.gt.f32.partialorder (%p424_p0), %v673_v59, 0.0  ;;  %v675_v62 = vld [vmem:[%s3347_s26 + $0x20] sm:$0xff] (%p424_p0)  ;;  %v676_v63 = vld [vmem:[%s3347_s26 + $0x28] sm:$0xff] (%p424_p0) }
 0x1c2   : > { %v449_v25 = vmax.f32 %v447_v22, 0.0  ;;  %v450_v26 = vmax.f32 %v448_v23, 0.0  ;;  %v688_v50 = vsel (%p424_p0), %vm680_vm7, 1, %v2482_v24  ;;  %v687_v61 = vsel (%p424_p0), %vm679_vm8, 1, %v2482_v24  ;;  %v677_v55 = vld [vmem:[%s3347_s26 + $0x30] sm:$0xff] (%p424_p0) }
 0x1c3   :  { %vm682_vm11 = vcmp.gt.f32.partialorder (%p424_p0), %v674_v60, 0.0  ;;  %v689_v0 = vsel (%p424_p0), %vm681_vm9, 1, %v2482_v24  ;;  %vm683_vm12 = vcmp.gt.f32.partialorder (%p424_p0), %v675_v62, 0.0  ;;  %vm684_vm13 = vcmp.gt.f32.partialorder (%p424_p0), %v676_v63, 0.0  ;;  %v678_v2 = vld [vmem:[%s3347_s26 + $0x38] sm:$0x3f] (%p424_p0) }
 0x1c4   : > { %2010 = vst.msk [vmem:[%s451_s30 + $0x8] sm:$0xff] %vm164_vm10, %v449_v25  ;;  %2011 = vst.msk [vmem:[%s451_s30 + $0x10] sm:$0xff] %vm164_vm10, %v450_v26  ;;  %v690_v1 = vsel (%p424_p0), %vm682_vm11, 1, %v2482_v24  ;;  %v691_v3 = vsel (%p424_p0), %vm683_vm12, 1, %v2482_v24  ;;  %v692_v4 = vsel (%p424_p0), %vm684_vm13, 1, %v2482_v24  ;;  %vm685_vm14 = vcmp.gt.f32.partialorder (%p424_p0), %v677_v55, 0.0 }
 0x1c5   :  { %vm686_vm15 = vcmp.gt.f32.partialorder %v678_v2, 0.0  ;;  %v693_v5 = vsel %vm685_vm14, 1, %v2482_v24 }
 0x1c6   :  { %v694_v6 = vsel %vm686_vm15, 1, %v2482_v24 }
 0x1cb   :  { %v476_v27 = vld [vmem:[#allocation3 + $0x2] sm:$0xff]  ;;  %v477_v28 = vld [vmem:[#allocation3 + $0xa] sm:$0xff]  ;;  %v478_v36 = vld [vmem:[#allocation3 + $0x12] sm:$0xff] }
 0x1cc   :  { %v468_v29 = vld [vmem:[#allocation3 + $0x1] sm:$0xff]  ;;  %v2289_v30 = vpack.i.bf16 %v477_v28, %v476_v27  ;;  %v469_v31 = vld [vmem:[#allocation3 + $0x9] sm:$0xff]  ;;  %v470_v40 = vld [vmem:[#allocation3 + $0x11] sm:$0xff] }
 0x1cd   :  { %v479_v37 = vld [vmem:[#allocation3 + $0x1a] sm:$0xff]  ;;  %v2279_v39 = vpack.i.bf16 %v469_v31, %v468_v29  ;;  %v474_v32 = vld [vmem:[#allocation3 + $0x31] sm:$0xff]  ;;  %v473_v45 = vld [vmem:[#allocation3 + $0x29] sm:$0xff] }
 0x1ce   :  { %v471_v41 = vld [vmem:[#allocation3 + $0x19] sm:$0xff]  ;;  %2290 = vrot.lane.b32.xlu1 %v2289_v30, %s2484_s5  ;;  %v2294_v33 = vpack.i.bf16 %v479_v37, %v478_v36  ;;  %v472_v34 = vld [vmem:[#allocation3 + $0x21] sm:$0xff]  ;;  %v481_v52 = vld [vmem:[#allocation3 + $0x2a] sm:$0xff] }
 0x1cf   :  { %2280 = vrot.lane.b32.xlu0 %v2279_v39, %s2480_s24  ;;  %v2284_v43 = vpack.i.bf16 %v471_v41, %v470_v40  ;;  %v475_v44 = vld [vmem:[#allocation3 + $0x39] sm:$0x3f]  ;;  %v2299_v47 = vpack.i.bf16 %v473_v45, %v472_v34  ;;  %v480_v51 = vld [vmem:[#allocation3 + $0x22] sm:$0xff]  ;;  %v462_v22 = vld [vmem:[#allocation3 + $0x10] sm:$0xff] }
 0x1d0   :  { %v2304_v46 = vpack.i.bf16 %v475_v44, %v474_v32  ;;  %v482_v48 = vld [vmem:[#allocation3 + $0x32] sm:$0xff]  ;;  %v483_v49 = vld [vmem:[#allocation3 + $0x3a] sm:$0x3f]  ;;  %v2309_v58 = vpack.i.bf16 %v481_v52, %v480_v51  ;;  %v460_v11 = vld [vmem:[#allocation3] sm:$0xff] }
 0x1d1   :  { %v2314_v42 = vpack.i.bf16 %v483_v49, %v482_v48  ;;  %v461_v12 = vld [vmem:[#allocation3 + $0x8] sm:$0xff]  ;;  %v463_v23 = vld [vmem:[#allocation3 + $0x18] sm:$0xff]  ;;  %v466_v32 = vld [vmem:[#allocation3 + $0x30] sm:$0xff] }
 0x1d2   :  { %2295 = vrot.lane.b32.xlu1 %v2294_v33, %s2484_s5  ;;  %v467_v44 = vld [vmem:[#allocation3 + $0x38] sm:$0x3f]  ;;  %v464_v35 = vld [vmem:[#allocation3 + $0x20] sm:$0xff] }
 0x1d3   :  { %2285 = vrot.lane.b32.xlu0 %v2284_v43, %s2480_s24 }
 0x1d6   :  { %2305 = vrot.lane.b32.xlu1 %v2304_v46, %s2480_s24  ;;  %v465_v46 = vld [vmem:[#allocation3 + $0x28] sm:$0xff] }
 0x1d7   :  { %2300 = vrot.lane.b32.xlu0 %v2299_v47, %s2480_s24 }
 0x1da   :  { %2315 = vrot.lane.b32.xlu1 %v2314_v42, %s2484_s5 }
 0x1db   :  { %2310 = vrot.lane.b32.xlu0 %v2309_v58, %s2484_s5 }
 0x1de   :  { %699 = vperm.xlu1 %2320, %v688_v50  }
 0x1df   :  { %696 = vperm.xlu0 %2319, %v687_v61  }
 0x1e2   :  { %702 = vperm.xlu1 %2320, %v689_v0  }
 0x1e3   :  { %705 = vperm.xlu0 %2319, %v690_v1  }
 0x1e6   :  { %708 = vperm.xlu1 %2320, %v691_v3  }
 0x1e7   :  { %711 = vperm.xlu0 %2319, %v692_v4  }
 0x1ea   :  { %714 = vperm.xlu1 %2320, %v693_v5  }
 0x1eb   :  { %717 = vperm.xlu0 %2319, %v694_v6  }
 0x240   :  { %v2291_v7 = vpop.permute.xlu1 %2290 }
 0x241   :  { %v2293_v8 = vunpack.i.h.bf16 %v2291_v7  ;;  %v2292_v9 = vunpack.i.l.bf16 %v2291_v7  ;;  %v2281_v10 = vpop.permute.xlu0 %2280 }
 0x242   :  { %v2283_v13 = vunpack.i.h.bf16 %v2281_v10  ;;  %v2282_v15 = vunpack.i.l.bf16 %v2281_v10 }
 0x244   :  { %v548_v17 = vsel %vm164_vm10, %v460_v11, %v2282_v15  ;;  %v549_v18 = vsel %vm164_vm10, %v461_v12, %v2283_v13  ;;  %v2296_v14 = vpop.permute.xlu1 %2295 }
 0x245   :  { %v2298_v19 = vunpack.i.h.bf16 %v2296_v14  ;;  %v2297_v20 = vunpack.i.l.bf16 %v2296_v14  ;;  %v2286_v21 = vpop.permute.xlu0 %2285  ;;  %v557_v25 = vsel %vm556_vm2, %v548_v17, %v2292_v9  ;;  %v558_v26 = vsel %vm556_vm2, %v549_v18, %v2293_v8 }
 0x246   :  { %v2288_v27 = vunpack.i.h.bf16 %v2286_v21  ;;  %v2287_v28 = vunpack.i.l.bf16 %v2286_v21  ;;  %v565_v29 = vpack.c.bf16 %v558_v26, %v557_v25 }
 0x248   :  { %v550_v30 = vsel %vm164_vm10, %v462_v22, %v2287_v28  ;;  %v551_v31 = vsel %vm164_vm10, %v463_v23, %v2288_v27  ;;  %2102 = vmatprep.mubr.msk.bf16.mxu1 %vm581_vm3, %v565_v29  ;;  %v2306_v36 = vpop.permute.xlu1 %2305 }
 0x249   :  { %v559_v37 = vsel %vm556_vm2, %v550_v30, %v2297_v20  ;;  %v560_v39 = vsel %vm556_vm2, %v551_v31, %v2298_v19  ;;  %v2301_v40 = vpop.permute.xlu0 %2300  ;;  %v2308_v33 = vunpack.i.h.bf16 %v2306_v36  ;;  %v2307_v43 = vunpack.i.l.bf16 %v2306_v36 }
 0x24a   :  { %v566_v41 = vpack.c.bf16 %v560_v39, %v559_v37  ;;  %v2303_v34 = vunpack.i.h.bf16 %v2301_v40  ;;  %v2302_v45 = vunpack.i.l.bf16 %v2301_v40 }
 0x24b   :  { %v554_v51 = vsel %vm164_vm10, %v466_v32, %v2307_v43  ;;  %v555_v52 = vsel %vm164_vm10, %v467_v44, %v2308_v33 }
 0x24c   :  { %2103 = vmatmul.mubr.msk.bf16.vlgmr.msra.gmra.mrb[0].mxu1 %vm581_vm3, %v566_v41  ;;  %v2316_v47 = vpop.permute.xlu1 %2315  ;;  %v552_v56 = vsel %vm164_vm10, %v464_v35, %v2302_v45  ;;  %v553_v42 = vsel %vm164_vm10, %v465_v46, %v2303_v34 }
 0x24d   :  { %v2318_v48 = vunpack.i.h.bf16 %v2316_v47  ;;  %v2317_v49 = vunpack.i.l.bf16 %v2316_v47  ;;  %v2311_v38 = vpop.permute.xlu0 %2310 }
 0x24e   :  { %v2313_v53 = vunpack.i.h.bf16 %v2311_v38  ;;  %v2312_v54 = vunpack.i.l.bf16 %v2311_v38 }
 0x24f   :  { %v563_v57 = vsel %vm556_vm2, %v554_v51, %v2317_v49  ;;  %v564_v58 = vsel %vm556_vm2, %v555_v52, %v2318_v48 }
 0x250   :  { %v568_v59 = vpack.c.bf16 %v564_v58, %v563_v57  ;;  %v561_v60 = vsel %vm556_vm2, %v552_v56, %v2312_v54  ;;  %v562_v50 = vsel %vm556_vm2, %v553_v42, %v2313_v53 }
 0x251   :  { %v567_v61 = vpack.c.bf16 %v562_v50, %v561_v60 }
 0x253   :  { %2106 = vmatprep.mubr.msk.bf16.mxu1 %vm581_vm3, %v567_v61 }
 0x254   :  { %2107 = vmatmul.mubr.msk.bf16.gmra.mrb[4].mxu1 %vm581_vm3, %v568_v59 }
 0x25d   :  { %v2901_v62 = vpop.permute.xlu1 %699 }
 0x25e   :  { %v2903_v63 = vpop.permute.xlu0 %696  ;;  %vm720_vm7 = vcmp.eq.s32.totalorder %v2901_v62, 1 }
 0x25f   :  { %vm719_vm4 = vcmp.eq.s32.totalorder %v2903_v63, 1 }
 0x261   :  { %v2905_v0 = vpop.permute.xlu1 %702 }
 0x262   :  { %v2907_v1 = vpop.permute.xlu0 %705  ;;  %vm721_vm5 = vcmp.eq.s32.totalorder %v2905_v0, 1 }
 0x263   :  { %vm722_vm8 = vcmp.eq.s32.totalorder %v2907_v1, 1 }
 0x265   :  { %v2912_v3 = vpop.permute.xlu1 %708 }
 0x266   :  { %v2920_v7 = vpop.permute.xlu0 %711  ;;  %vm723_vm9 = vcmp.eq.s32.totalorder %v2912_v3, 1 }
 0x267   :  { %vm724_vm11 = vcmp.eq.s32.totalorder %v2920_v7, 1 }
 0x269   :  { %v2932_v17 = vpop.permute.xlu1 %714 }
 0x26a   :  { %v2937_v21 = vpop.permute.xlu0 %717  ;;  %vm725_vm12 = vcmp.eq.s32.totalorder %v2932_v17, 1 }
 0x26b   :  { %vm726_vm13 = vcmp.eq.s32.totalorder %v2937_v21, 1 }
 0x31f   :  { %v2104_v55 = vpop.f32.mrb[0].mxu1 }
 0x320   :  { %665 = vst.msk [vmem:[#allocation2 + $0x10] sm:$0xff] %vm164_vm10, %v2104_v55  ;;  %v632_v2 = vpop.f32.mrb[1].mxu1  ;;  %v729_v8 = vsel %vm721_vm5, %v2104_v55, 0.0 }
 0x321   :  { %663 = vst.msk [vmem:[#allocation2] sm:$0xff] %vm164_vm10, %v632_v2  ;;  %v727_v4 = vsel %vm719_vm4, %v632_v2, 0.0  ;;  %v2105_v5 = vpop.f32.mrb[2].mxu1  ;;  %v738_v15 = vsel %vm164_vm10, %v729_v8, 0.0 }
 0x322   :  { %666 = vst.msk [vmem:[#allocation2 + $0x18] sm:$0xff] %vm164_vm10, %v2105_v5  ;;  %v635_v6 = vpop.f32.mrb[3].mxu1  ;;  %v735_v10 = vsel %vm164_vm10, %v727_v4, 0.0  ;;  %v730_v12 = vsel %vm722_vm8, %v2105_v5, 0.0 }
 0x323   :  { %664 = vst.msk [vmem:[#allocation2 + $0x8] sm:$0xff] %vm164_vm10, %v635_v6  ;;  %v728_v9 = vsel %vm720_vm7, %v635_v6, 0.0  ;;  %v740_v19 = vsel %vm164_vm10, %v730_v12, 0.0 }
 0x324   :  { %v736_v11 = vsel %vm164_vm10, %v728_v9, 0.0 }
 0x325   :  { %v737_v13 = vadd.f32 %v736_v11, %v735_v10 }
 0x327   :  { %v739_v18 = vadd.f32 %v738_v15, %v737_v13  ;;  %v2108_v14 = vpop.f32.mrb[4].mxu1  ;;  %v759_v46 = vld [vmem:[#allocation2 + $0x10] sm:$0xff] }
 0x328   :  { %669 = vst.msk [vmem:[#allocation2 + $0x30] sm:$0xff] %vm164_vm10, %v2108_v14  ;;  %v648_v20 = vpop.f32.mrb[5].mxu1  ;;  %v733_v28 = vsel %vm725_vm12, %v2108_v14, 0.0  ;;  %v757_v48 = vld [vmem:[#allocation2] sm:$0xff] }
 0x329   :  { %667 = vst.msk [vmem:[#allocation2 + $0x20] sm:$0xff] %vm164_vm10, %v648_v20  ;;  %v731_v22 = vsel %vm723_vm9, %v648_v20, 0.0  ;;  %v741_v23 = vadd.f32 %v740_v19, %v739_v18  ;;  %v2109_v25 = vpop.f32.mrb[6].mxu1  ;;  %v746_v39 = vsel %vm164_vm10, %v733_v28, 0.0  ;;  %v760_v49 = vld [vmem:[#allocation2 + $0x18] sm:$0xff] }
 0x32a   :  { %v742_v26 = vsel %vm164_vm10, %v731_v22, 0.0  ;;  %670 = vst.msk [vmem:[#allocation2 + $0x38] sm:$0x3f] %vm273_vm1, %v2109_v25  ;;  %v651_v27 = vpop.f32.mrb[7].mxu1  ;;  %v734_v36 = vsel %vm726_vm13, %v2109_v25, 0.0  ;;  %v758_v38 = vld [vmem:[#allocation2 + $0x8] sm:$0xff] }
 0x32b   :  { %v743_v29 = vadd.f32 %v742_v26, %v741_v23  ;;  %668 = vst.msk [vmem:[#allocation2 + $0x28] sm:$0xff] %vm164_vm10, %v651_v27  ;;  %v732_v30 = vsel %vm724_vm11, %v651_v27, 0.0  ;;  %v748_v41 = vsel %vm273_vm1, %v734_v36, 0.0 }
 0x32c   :  { %v744_v31 = vsel %vm164_vm10, %v732_v30, 0.0 }
 0x32d   :  { %v745_v37 = vadd.f32 %v744_v31, %v743_v29 }
 0x32f   :  { %v747_v40 = vadd.f32 %v746_v39, %v745_v37  ;;  %v763_v55 = vld [vmem:[#allocation2 + $0x30] sm:$0xff] }
 0x330   :  { %v761_v51 = vld [vmem:[#allocation2 + $0x20] sm:$0xff] }
 0x331   :  { %v749_v33 = vadd.f32 %v748_v41, %v747_v40  ;;  %v764_v63 = vld [vmem:[#allocation2 + $0x38] sm:$0x3f] }
 0x332   :  { %v762_v57 = vld [vmem:[#allocation2 + $0x28] sm:$0xff] }
 0x333   :  { %v750_v43 = vrot.slane %v749_v33, 4 }
 0x335   :  { %v751_v32 = vadd.f32 %v750_v43, %v749_v33  ;;  %v811_v43 = vld [vmem:[%s3318_s7] sm:$0x1] }
 0x337   :  { %v752_v44 = vrot.slane %v751_v32, 2 }
 0x339   :  { %v753_v34 = vadd.f32 %v752_v44, %v751_v32 }
 0x33b   :  { %v754_v45 = vrot.slane %v753_v34, 1 }
 0x33d   :  { %v755_v35 = vadd.f32 %v754_v45, %v753_v34  ;;  %v815_v34 = vld [vmem:[%s3319_s8] sm:$0x1] }
 0x33f   :  { %v756_v47 = vmul.f32 0.03125, %v755_v35 }
 0x341   :  { %v765_v52 = vsub.f32 %v757_v48, %v756_v47  ;;  %v766_v53 = vsub.f32 %v758_v38, %v756_v47  ;;  %v767_v54 = vsub.f32 %v759_v46, %v756_v47  ;;  %v768_v56 = vsub.f32 %v760_v49, %v756_v47 }
 0x342   :  { %v769_v42 = vsub.f32 %v761_v51, %v756_v47  ;;  %v770_v50 = vsub.f32 %v762_v57, %v756_v47  ;;  %v771_v6 = vsub.f32 %v763_v55, %v756_v47  ;;  %v772_v0 = vsub.f32 %v764_v63, %v756_v47 }
 0x343   :  { %v773_v58 = vsel %vm719_vm4, %v765_v52, 0.0  ;;  %v774_v59 = vsel %vm720_vm7, %v766_v53, 0.0  ;;  %v775_v60 = vsel %vm721_vm5, %v767_v54, 0.0  ;;  %v776_v61 = vsel %vm722_vm8, %v768_v56, 0.0 }
 0x344   :  { %v781_v2 = vmul.f32 %v773_v58, %v773_v58  ;;  %v782_v4 = vmul.f32 %v774_v59, %v774_v59  ;;  %v783_v5 = vmul.f32 %v775_v60, %v775_v60  ;;  %v777_v8 = vsel %vm723_vm9, %v769_v42, 0.0 }
 0x345   :  { %v784_v9 = vmul.f32 %v776_v61, %v776_v61  ;;  %v778_v11 = vsel %vm724_vm11, %v770_v50, 0.0  ;;  %v785_v12 = vmul.f32 %v777_v8, %v777_v8  ;;  %v779_v15 = vsel %vm725_vm12, %v771_v6, 0.0 }
 0x346   :  { %v789_v62 = vsel %vm164_vm10, %v781_v2, 0.0  ;;  %v790_v10 = vsel %vm164_vm10, %v782_v4, 0.0  ;;  %v792_v13 = vsel %vm164_vm10, %v783_v5, 0.0  ;;  %v786_v3 = vmul.f32 %v778_v11, %v778_v11 }
 0x347   :  { %v791_v1 = vadd.f32 %v790_v10, %v789_v62  ;;  %v794_v14 = vsel %vm164_vm10, %v784_v9, 0.0  ;;  %v780_v19 = vsel %vm726_vm13, %v772_v0, 0.0  ;;  %v787_v22 = vmul.f32 %v779_v15, %v779_v15 }
 0x348   :  { %v796_v23 = vsel %vm164_vm10, %v785_v12, 0.0  ;;  %v788_v25 = vmul.f32 %v780_v19, %v780_v19  ;;  %v798_v26 = vsel %vm164_vm10, %v786_v3, 0.0 }
 0x349   :  { %v793_v18 = vadd.f32 %v792_v13, %v791_v1  ;;  %v800_v28 = vsel %vm164_vm10, %v787_v22, 0.0 }
 0x34a   :  { %v802_v29 = vsel %vm273_vm1, %v788_v25, 0.0 }
 0x34b   :  { %v795_v20 = vadd.f32 %v794_v14, %v793_v18 }
 0x34d   :  { %v797_v7 = vadd.f32 %v796_v23, %v795_v20 }
 0x34f   :  { %v799_v27 = vadd.f32 %v798_v26, %v797_v7 }
 0x351   :  { %v801_v17 = vadd.f32 %v800_v28, %v799_v27 }
 0x353   :  { %v803_v30 = vadd.f32 %v802_v29, %v801_v17 }
 0x355   :  { %v804_v31 = vrot.slane %v803_v30, 4 }
 0x357   :  { %v805_v36 = vadd.f32 %v804_v31, %v803_v30 }
 0x359   :  { %v806_v37 = vrot.slane %v805_v36, 2 }
 0x35b   :  { %v807_v21 = vadd.f32 %v806_v37, %v805_v36 }
 0x35d   :  { %v808_v39 = vrot.slane %v807_v21, 1 }
 0x35f   :  { %v809_v40 = vadd.f32 %v808_v39, %v807_v21 }
 0x361   :  { %v810_v41 = vmul.f32 0.03125, %v809_v40 }
 0x363   :  { %v812_v33 = vadd.f32 1e-05, %v810_v41 }
 0x365   :  { %2323 = vrsqrt.f32 %v812_v33 }
 0x36f   :  { %v2324_v32 = vpop.eup %2323 }
 0x370   :  { %v814_v44 = vmul.f32 %v2324_v32, %v811_v43 }
 0x372   :  { %v816_v45 = vmul.f32 %v814_v44, %v756_v47 }
 0x374   :  { %v817_v35 = vsub.f32 %v815_v34, %v816_v45 }
 0x375 LB: > { %v836_v46 = vrot.slane %v814_v44, %v2827_v16  ;;  %s825_s4 = smul.u32 24, %s2470_s28  ;;  %s2018_s29 = sshll.u32 %s2470_s28, 5  ;;  %v2486_v51 = vmov 0.0   ;;  %s2470_s28 = sphi %s2468_s28, %s823_s28  }
 0x376   : > { %v843_v48 = vrot.slane %v817_v35, %v2827_v16  ;;  %s1940_s30 = scalar_lea.vmem [#allocation2], %s2018_s29  ;;  %s823_s28 = sadd.s32 1, %s2470_s28  }
 0x377   : > { %v2019_v49 = vld [vmem:[%s1940_s30 + $0x7] ss:$2 sm:$0xff]  ;;  %v2021_v38 = vld [vmem:[%s1940_s30 + $0x8] ss:$2 sm:$0xff]  ;;  %s850_s7 = scalar_lea.vmem [#allocation4], %s825_s4  ;;  %p820_p1 = scmp.ge.s32.totalorder %s823_s28, 2  }
 0x378   : > { %851 = vst.msk [vmem:[%s850_s7] sm:$0xff] %vm164_vm10, %v2486_v51  ;;  %2022 = vst.msk [vmem:[%s850_s7 + $0x10] sm:$0xff] %vm164_vm10, %v2486_v51  ;;  %v838_v47 = vmul.f32 %v2019_v49, %v836_v46  ;;  %v846_v52 = vmul.f32 %v2021_v38, %v836_v46  ;;  %v2487_v2 = vmov (%p820_p1), 0.0   ;;  %vm2488_vm14 = vmmov (%p820_p1), 0   ;;  %v2357_v11 = vld [vmem:[%s3320_s9] sm:$0xff] (%p820_p1)   ;;  %s3348_s3 = sld [smem:[#allocation9_spill]] (%p820_p1) }
 0x379   :  { %2110 = vmatprep.subr.bf16.mxu0 (%p820_p1), %v2487_v2  ;;  %2114 = vmatprep.mubr.msk.bf16.mxu0 (%p820_p1), %vm2488_vm14, %v2487_v2  ;;  %v2358_v1 = vld [vmem:[%s3320_s9 + $0x8] ss:$0 sps:$4 sm:$0xff] (%p820_p1)   ;;  %v2489_v19 = vmov (%p820_p1), 2   ;;  %s2472_s22 = smov (%p820_p1), 0  }
 0x37a   : > { %v845_v53 = vadd.f32 %v843_v48, %v838_v47  ;;  %v847_v54 = vadd.f32 %v846_v52, %v843_v48  ;;  %822 = sbr.rel (!%p820_p1) target bundleno = 885 (0x375), region = 157  ;;  %2111 = vmatpush3.bf16.msra.mxu0 (%p820_p1), %v2357_v11  ;;  %v961_v15 = vsel (%p820_p1), %vm594_vm6, %v2358_v1, 0  ;;  %2356 = vset.pattern.permute.xlu1 (%p820_p1), %v2489_v19 }
 0x37b   :  { %2112 = vmatprep.subr.bf16.mxu0 (%p820_p1), %v2487_v2  ;;  %2355 = vset.pattern.permute.xlu0 (%p820_p1), %v2489_v19 }
 0x37c   : > { %v848_v56 = vmax.f32 %v845_v53, %v847_v54 }
 0x37e   : > { %v849_v42 = vmax.f32 %v848_v56, 0.0  ;;  %2113 = vmatpush3.bf16.msra.mxu0 (%p820_p1), %v961_v15  ;;  %v1027_v18 = vld [vmem:[%s3348_s3 + $0x8] sm:$0xff] (%p820_p1)  ;;  %v1026_v3 = vld [vmem:[%s3348_s3] sm:$0xff] (%p820_p1)  ;;  %v1028_v14 = vld [vmem:[%s3348_s3 + $0x10] sm:$0xff] (%p820_p1) }
 0x37f   :  { %vm1033_vm15 = vcmp.gt.f32.partialorder (%p820_p1), %v1027_v18, 0.0  ;;  %vm1032_vm4 = vcmp.gt.f32.partialorder (%p820_p1), %v1026_v3, 0.0  ;;  %vm1034_vm5 = vcmp.gt.f32.partialorder (%p820_p1), %v1028_v14, 0.0  ;;  %v1029_v20 = vld [vmem:[%s3348_s3 + $0x18] sm:$0xff] (%p820_p1)  ;;  %v1030_v7 = vld [vmem:[%s3348_s3 + $0x20] sm:$0xff] (%p820_p1) }
 0x380   : > { %2023 = vst.msk [vmem:[%s850_s7 + $0x8] sm:$0xff] %vm164_vm10, %v849_v42  ;;  %v1039_v22 = vsel (%p820_p1), %vm1033_vm15, 1, %v2482_v24  ;;  %v1038_v23 = vsel (%p820_p1), %vm1032_vm4, 1, %v2482_v24  ;;  %vm1035_vm7 = vcmp.gt.f32.partialorder (%p820_p1), %v1029_v20, 0.0  ;;  %v1031_v25 = vld [vmem:[%s3348_s3 + $0x28] sm:$0x3f] (%p820_p1) }
 0x381   :  { %v1040_v26 = vsel %vm1034_vm5, 1, %v2482_v24  ;;  %v1041_v27 = vsel %vm1035_vm7, 1, %v2482_v24  ;;  %vm1036_vm8 = vcmp.gt.f32.partialorder %v1030_v7, 0.0  ;;  %vm1037_vm9 = vcmp.gt.f32.partialorder %v1031_v25, 0.0 }
 0x382   :  { %v1042_v28 = vsel %vm1036_vm8, 1, %v2482_v24  ;;  %v1043_v17 = vsel %vm1037_vm9, 1, %v2482_v24 }
 0x387   :  { %v864_v57 = vld [vmem:[#allocation4 + $0x1] sm:$0xff]  ;;  %v865_v58 = vld [vmem:[#allocation4 + $0x9] sm:$0xff]  ;;  %v866_v61 = vld [vmem:[#allocation4 + $0x11] sm:$0xff] }
 0x388   :  { %v870_v59 = vld [vmem:[#allocation4 + $0x2] sm:$0xff]  ;;  %v2325_v60 = vpack.i.bf16 %v865_v58, %v864_v57  ;;  %v871_v50 = vld [vmem:[#allocation4 + $0xa] sm:$0xff]  ;;  %v867_v55 = vld [vmem:[#allocation4 + $0x19] sm:$0xff] }
 0x389   :  { %v2335_v4 = vpack.i.bf16 %v867_v55, %v866_v61  ;;  %v872_v5 = vld [vmem:[#allocation4 + $0x12] sm:$0xff]  ;;  %v873_v6 = vld [vmem:[#allocation4 + $0x1a] sm:$0xff]  ;;  %v2330_v8 = vpack.i.bf16 %v871_v50, %v870_v59  ;;  %v869_v62 = vld [vmem:[#allocation4 + $0x29] sm:$0x3f] }
 0x38a   :  { %2326 = vrot.lane.b32.xlu0 %v2325_v60, %s2480_s24  ;;  %v868_v63 = vld [vmem:[#allocation4 + $0x21] sm:$0xff]  ;;  %v2340_v9 = vpack.i.bf16 %v873_v6, %v872_v5  ;;  %v875_v0 = vld [vmem:[#allocation4 + $0x2a] sm:$0x3f]  ;;  %v860_v46 = vld [vmem:[#allocation4 + $0x10] sm:$0xff] }
 0x38b   :  { %2336 = vrot.lane.b32.xlu1 %v2335_v4, %s2480_s24  ;;  %v874_v10 = vld [vmem:[#allocation4 + $0x22] sm:$0xff]  ;;  %v2345_v12 = vpack.i.bf16 %v869_v62, %v868_v63  ;;  %v861_v48 = vld [vmem:[#allocation4 + $0x18] sm:$0xff] }
 0x38c   :  { %v2350_v13 = vpack.i.bf16 %v875_v0, %v874_v10  ;;  %v858_v37 = vld [vmem:[#allocation4] sm:$0xff]  ;;  %v859_v21 = vld [vmem:[#allocation4 + $0x8] sm:$0xff] }
 0x38d   :  { %v862_v59 = vld [vmem:[#allocation4 + $0x20] sm:$0xff]  ;;  %v863_v60 = vld [vmem:[#allocation4 + $0x28] sm:$0x3f] }
 0x38e   :  { %2331 = vrot.lane.b32.xlu0 %v2330_v8, %s2484_s5 }
 0x38f   :  { %2341 = vrot.lane.b32.xlu1 %v2340_v9, %s2484_s5 }
 0x392   :  { %2346 = vrot.lane.b32.xlu0 %v2345_v12, %s2480_s24 }
 0x393   :  { %2351 = vrot.lane.b32.xlu1 %v2350_v13, %s2484_s5 }
 0x396   :  { %1045 = vperm.xlu0 %2355, %v1038_v23  }
 0x397   :  { %1048 = vperm.xlu1 %2356, %v1039_v22  }
 0x39a   :  { %1054 = vperm.xlu0 %2355, %v1041_v27  }
 0x39b   :  { %1051 = vperm.xlu1 %2356, %v1040_v26  }
 0x39e   :  { %1060 = vperm.xlu0 %2355, %v1043_v17  }
 0x39f   :  { %1057 = vperm.xlu1 %2356, %v1042_v28  }
 0x3fc   :  { %v2327_v29 = vpop.permute.xlu0 %2326 }
 0x3fd   :  { %v2337_v30 = vpop.permute.xlu1 %2336  ;;  %v2329_v31 = vunpack.i.h.bf16 %v2327_v29  ;;  %v2328_v36 = vunpack.i.l.bf16 %v2327_v29 }
 0x3fe   :  { %v2339_v32 = vunpack.i.h.bf16 %v2337_v30  ;;  %v2338_v44 = vunpack.i.l.bf16 %v2337_v30 }
 0x3ff   :  { %v924_v33 = vsel %vm164_vm10, %v858_v37, %v2328_v36  ;;  %v925_v43 = vsel %vm164_vm10, %v859_v21, %v2329_v31 }
 0x400   :  { %v2332_v39 = vpop.permute.xlu0 %2331  ;;  %v926_v52 = vsel %vm164_vm10, %v860_v46, %v2338_v44  ;;  %v927_v53 = vsel %vm164_vm10, %v861_v48, %v2339_v32 }
 0x401   :  { %v2334_v40 = vunpack.i.h.bf16 %v2332_v39  ;;  %v2333_v41 = vunpack.i.l.bf16 %v2332_v39  ;;  %v2342_v34 = vpop.permute.xlu1 %2341 }
 0x402   :  { %v2344_v38 = vunpack.i.h.bf16 %v2342_v34  ;;  %v2343_v51 = vunpack.i.l.bf16 %v2342_v34 }
 0x403   :  { %v930_v45 = vsel %vm556_vm2, %v924_v33, %v2333_v41  ;;  %v931_v35 = vsel %vm556_vm2, %v925_v43, %v2334_v40 }
 0x404   :  { %v936_v49 = vpack.c.bf16 %v931_v35, %v930_v45  ;;  %v2347_v47 = vpop.permute.xlu0 %2346  ;;  %v932_v57 = vsel %vm556_vm2, %v926_v52, %v2343_v51  ;;  %v933_v58 = vsel %vm556_vm2, %v927_v53, %v2344_v38 }
 0x405   :  { %v2349_v54 = vunpack.i.h.bf16 %v2347_v47  ;;  %v2348_v56 = vunpack.i.l.bf16 %v2347_v47  ;;  %v2352_v42 = vpop.permute.xlu1 %2351  ;;  %v937_v55 = vpack.c.bf16 %v933_v58, %v932_v57 }
 0x406   :  { %2115 = vmatmul.mubr.msk.bf16.vlgmr.msra.gmra.mrb[8].mxu0 %vm581_vm3, %v936_v49  ;;  %v2354_v50 = vunpack.i.h.bf16 %v2352_v42  ;;  %v2353_v61 = vunpack.i.l.bf16 %v2352_v42 }
 0x407   :  { %2118 = vmatprep.mubr.msk.bf16.mxu0 %vm2488_vm14, %v2487_v2  ;;  %v928_v4 = vsel %vm164_vm10, %v862_v59, %v2348_v56  ;;  %v929_v5 = vsel %vm164_vm10, %v863_v60, %v2349_v54 }
 0x408   :  { %v934_v6 = vsel %vm556_vm2, %v928_v4, %v2353_v61  ;;  %v935_v8 = vsel %vm556_vm2, %v929_v5, %v2354_v50 }
 0x409   :  { %v938_v63 = vpack.c.bf16 %v935_v8, %v934_v6 }
 0x40e   :  { %2119 = vmatmul.mubr.msk.bf16.gmra.mrb[12].mxu0 %vm581_vm3, %v937_v55 }
 0x40f   :  { %2122 = vmatprep.mubr.msk.bf16.mxu0 %vm2488_vm14, %v2487_v2 }
 0x415   :  { %v3052_v9 = vpop.permute.xlu0 %1045 }
 0x416   :  { %2123 = vmatmul.mubr.msk.bf16.gmra.mrb[16].mxu0 %vm581_vm3, %v938_v63  ;;  %vm1062_vm11 = vcmp.eq.s32.totalorder %v3052_v9, 1  ;;  %v3055_v62 = vpop.permute.xlu1 %1048 }
 0x417   :  { %vm1063_vm12 = vcmp.eq.s32.totalorder %v3055_v62, 1 }
 0x419   :  { %v1055_v19 = vpop.permute.xlu0 %1054 }
 0x41a   :  { %v1052_v14 = vpop.permute.xlu1 %1051  ;;  %vm1065_vm15 = vcmp.eq.s32.totalorder %v1055_v19, 1 }
 0x41b   :  { %vm1064_vm13 = vcmp.eq.s32.totalorder %v1052_v14, 1 }
 0x41d   :  { %v1061_v31 = vpop.permute.xlu0 %1060 }
 0x41e   :  { %v1058_v29 = vpop.permute.xlu1 %1057  ;;  %vm1067_vm5 = vcmp.eq.s32.totalorder %v1061_v31, 1  ;;  %v1134_v31 = vld [vmem:[%s3321_s10] sm:$0x1] }
 0x41f   :  { %vm1066_vm4 = vcmp.eq.s32.totalorder %v1058_v29, 1 }
 0x4d9   :  { %v997_v10 = vpop.f32.mrb[8].mxu0 }
 0x4da   :  { %1020 = vst.msk [vmem:[#allocation2] sm:$0xff] %vm164_vm10, %v997_v10  ;;  %v1068_v0 = vsel %vm1062_vm11, %v997_v10, 0.0  ;;  %v2116_v11 = vpop.f32.mrb[9].mxu0 }
 0x4db   :  { %v1000_v1 = vpop.f32.mrb[10].mxu0  ;;  %v1074_v15 = vsel %vm164_vm10, %v1068_v0, 0.0 }
 0x4dc   :  { %1021 = vst.msk [vmem:[#allocation2 + $0x8] sm:$0xff] %vm164_vm10, %v1000_v1  ;;  %v1069_v12 = vsel %vm1063_vm12, %v1000_v1, 0.0  ;;  %v2117_v13 = vpop.f32.mrb[11].mxu0 }
 0x4dd   :  { %v1075_v18 = vsel %vm164_vm10, %v1069_v12, 0.0 }
 0x4de   :  { %v1076_v3 = vadd.f32 %v1075_v18, %v1074_v15 }
 0x4e1   :  { %v1005_v20 = vpop.f32.mrb[12].mxu0  ;;  %v1092_v38 = vld [vmem:[#allocation2] sm:$0xff] }
 0x4e2   :  { %1022 = vst.msk [vmem:[#allocation2 + $0x10] sm:$0xff] %vm164_vm10, %v1005_v20  ;;  %v1070_v22 = vsel %vm1064_vm13, %v1005_v20, 0.0  ;;  %v2120_v23 = vpop.f32.mrb[13].mxu0 }
 0x4e3   :  { %v1077_v7 = vsel %vm164_vm10, %v1070_v22, 0.0  ;;  %v1008_v25 = vpop.f32.mrb[14].mxu0  ;;  %v1093_v47 = vld [vmem:[#allocation2 + $0x8] sm:$0xff] }
 0x4e4   :  { %v1078_v26 = vadd.f32 %v1077_v7, %v1076_v3  ;;  %1023 = vst.msk [vmem:[#allocation2 + $0x18] sm:$0xff] %vm164_vm10, %v1008_v25  ;;  %v1071_v27 = vsel %vm1065_vm15, %v1008_v25, 0.0  ;;  %v2121_v28 = vpop.f32.mrb[15].mxu0 }
 0x4e5   :  { %v1079_v17 = vsel %vm164_vm10, %v1071_v27, 0.0 }
 0x4e6   :  { %v1080_v30 = vadd.f32 %v1079_v17, %v1078_v26 }
 0x4e9   :  { %v1013_v36 = vpop.f32.mrb[16].mxu0  ;;  %v1094_v52 = vld [vmem:[#allocation2 + $0x10] sm:$0xff] }
 0x4ea   :  { %1024 = vst.msk [vmem:[#allocation2 + $0x20] sm:$0xff] %vm164_vm10, %v1013_v36  ;;  %v1072_v37 = vsel %vm1066_vm4, %v1013_v36, 0.0  ;;  %v2124_v21 = vpop.f32.mrb[17].mxu0 }
 0x4eb   :  { %v1081_v39 = vsel %vm164_vm10, %v1072_v37, 0.0  ;;  %v1016_v40 = vpop.f32.mrb[18].mxu0  ;;  %v1095_v53 = vld [vmem:[#allocation2 + $0x18] sm:$0xff]  ;;  %v1138_v21 = vld [vmem:[%s3322_s11] sm:$0x1] }
 0x4ec   :  { %v1082_v41 = vadd.f32 %v1081_v39, %v1080_v30  ;;  %1025 = vst.msk [vmem:[#allocation2 + $0x28] sm:$0x3f] %vm273_vm1, %v1016_v40  ;;  %v1073_v33 = vsel %vm1067_vm5, %v1016_v40, 0.0  ;;  %v2125_v43 = vpop.f32.mrb[19].mxu0 }
 0x4ed   :  { %v1083_v32 = vsel %vm273_vm1, %v1073_v33, 0.0 }
 0x4ee   :  { %v1084_v44 = vadd.f32 %v1083_v32, %v1082_v41 }
 0x4f0   :  { %v1085_v34 = vrot.slane %v1084_v44, 4 }
 0x4f1   :  { %v1096_v54 = vld [vmem:[#allocation2 + $0x20] sm:$0xff] }
 0x4f2   :  { %v1086_v45 = vadd.f32 %v1085_v34, %v1084_v44 }
 0x4f3   :  { %v1097_v56 = vld [vmem:[#allocation2 + $0x28] sm:$0x3f] }
 0x4f4   :  { %v1087_v35 = vrot.slane %v1086_v45, 2 }
 0x4f6   :  { %v1088_v46 = vadd.f32 %v1087_v35, %v1086_v45 }
 0x4f8   :  { %v1089_v48 = vrot.slane %v1088_v46, 1 }
 0x4fa   :  { %v1090_v49 = vadd.f32 %v1089_v48, %v1088_v46 }
 0x4fc   :  { %v1091_v51 = vmul.f32 0.0625, %v1090_v49 }
 0x4fe   :  { %v1098_v42 = vsub.f32 %v1092_v38, %v1091_v51  ;;  %v1099_v57 = vsub.f32 %v1093_v47, %v1091_v51  ;;  %v1100_v58 = vsub.f32 %v1094_v52, %v1091_v51  ;;  %v1101_v59 = vsub.f32 %v1095_v53, %v1091_v51 }
 0x4ff   :  { %v1102_v60 = vsub.f32 %v1096_v54, %v1091_v51  ;;  %v1103_v50 = vsub.f32 %v1097_v56, %v1091_v51 }
 0x500   :  { %v1104_v61 = vsel %vm1062_vm11, %v1098_v42, 0.0  ;;  %v1105_v55 = vsel %vm1063_vm12, %v1099_v57, 0.0  ;;  %v1106_v4 = vsel %vm1064_vm13, %v1100_v58, 0.0  ;;  %v1107_v5 = vsel %vm1065_vm15, %v1101_v59, 0.0 }
 0x501   :  { %v1110_v6 = vmul.f32 %v1104_v61, %v1104_v61  ;;  %v1111_v8 = vmul.f32 %v1105_v55, %v1105_v55  ;;  %v1108_v63 = vsel %vm1066_vm4, %v1102_v60, 0.0  ;;  %v1112_v10 = vmul.f32 %v1106_v4, %v1106_v4 }
 0x502   :  { %v1113_v0 = vmul.f32 %v1107_v5, %v1107_v5  ;;  %v1109_v9 = vsel %vm1067_vm5, %v1103_v50, 0.0  ;;  %v1114_v13 = vmul.f32 %v1108_v63, %v1108_v63 }
 0x503   :  { %v1116_v11 = vsel %vm164_vm10, %v1110_v6, 0.0  ;;  %v1117_v1 = vsel %vm164_vm10, %v1111_v8, 0.0  ;;  %v1119_v62 = vsel %vm164_vm10, %v1112_v10, 0.0  ;;  %v1115_v18 = vmul.f32 %v1109_v9, %v1109_v9 }
 0x504   :  { %v1118_v12 = vadd.f32 %v1117_v1, %v1116_v11  ;;  %v1121_v3 = vsel %vm164_vm10, %v1113_v0, 0.0  ;;  %v1123_v19 = vsel %vm164_vm10, %v1114_v13, 0.0 }
 0x505   :  { %v1125_v22 = vsel %vm273_vm1, %v1115_v18, 0.0 }
 0x506   :  { %v1120_v15 = vadd.f32 %v1119_v62, %v1118_v12 }
 0x508   :  { %v1122_v14 = vadd.f32 %v1121_v3, %v1120_v15 }
 0x50a   :  { %v1124_v20 = vadd.f32 %v1123_v19, %v1122_v14 }
 0x50c   :  { %v1126_v23 = vadd.f32 %v1125_v22, %v1124_v20 }
 0x50e   :  { %v1127_v7 = vrot.slane %v1126_v23, 4 }
 0x510   :  { %v1128_v25 = vadd.f32 %v1127_v7, %v1126_v23 }
 0x512   :  { %v1129_v26 = vrot.slane %v1128_v25, 2 }
 0x514   :  { %v1130_v27 = vadd.f32 %v1129_v26, %v1128_v25 }
 0x516   :  { %v1131_v28 = vrot.slane %v1130_v27, 1 }
 0x518   :  { %v1132_v17 = vadd.f32 %v1131_v28, %v1130_v27 }
 0x51a   :  { %v1133_v29 = vmul.f32 0.0625, %v1132_v17 }
 0x51c   :  { %v1135_v30 = vadd.f32 1e-05, %v1133_v29 }
 0x51e   :  { %2359 = vrsqrt.f32 %v1135_v30 }
 0x528   :  { %v2360_v36 = vpop.eup %2359 }
 0x529   :  { %v1137_v37 = vmul.f32 %v2360_v36, %v1134_v31 }
 0x52b   :  { %v1139_v39 = vmul.f32 %v1137_v37, %v1091_v51 }
 0x52d   :  { %v1140_v40 = vsub.f32 %v1138_v21, %v1139_v39 }
 0x52e LB: > { %s1147_s21 = smul.u32 24, %s2474_s22  ;;  %v1155_v41 = vrot.slane %v1137_v37, %v2827_v16  ;;  %v2490_v43 = vmov 0.0   ;;  %s1146_s22 = sadd.s32 1, %s2474_s22   ;;  %s2474_s22 = sphi %s2472_s22, %s1146_s22  }
 0x52f   : > { %v1162_v33 = vrot.slane %v1140_v40, %v2827_v16  ;;  %p1143_p2 = scmp.ge.s32.totalorder %s1146_s22, 2  }
 0x530   : > { %s1166_s25 = scalar_lea.vmem [#allocation3], %s1147_s21  ;;  %s1954_s10 = scalar_lea.vmem [#allocation2], %s1147_s21  ;;  %2126 = vmatprep.subr.bf16.mxu1 (%p1143_p2), %v2487_v2  ;;  %2130 = vmatprep.mubr.msk.bf16.mxu1 (%p1143_p2), %vm2488_vm14, %v2487_v2  ;;  %v2393_v50 = vld [vmem:[%s3323_s12] sm:$0xff] (%p1143_p2)   ;;  %v2394_v61 = vld [vmem:[%s3323_s12 + $0x8] ss:$0 sps:$4 sm:$0xff] (%p1143_p2)   ;;  %v2491_v10 = vmov (%p1143_p2), 3  }
 0x531   : > { %1167 = vst.msk [vmem:[%s1166_s25] sm:$0xff] %vm164_vm10, %v2490_v43  ;;  %2030 = vst.msk [vmem:[%s1166_s25 + $0x10] sm:$0xff] %vm164_vm10, %v2490_v43  ;;  %v2029_v32 = vld [vmem:[%s1954_s10 + $0x7] sm:$0xff]  ;;  %2127 = vmatpush3.bf16.msra.mxu1 (%p1143_p2), %v2393_v50  ;;  %v1277_v5 = vsel (%p1143_p2), %vm594_vm6, %v2394_v61, 0  ;;  %s3349_s2 = sld [smem:[#allocation9_spill]] (%p1143_p2)  ;;  %2392 = vset.pattern.permute.xlu1 (%p1143_p2), %v2491_v10  ;;  %vm1336_vm13 = vcmask (%p1143_p2), 89088  }
 0x532   : > { %v1157_v44 = vmul.f32 %v2029_v32, %v1155_v41  ;;  %1145 = sbr.rel (!%p1143_p2) target bundleno = 1326 (0x52e), region = 168  ;;  %2128 = vmatprep.subr.bf16.mxu1 (%p1143_p2), %v2487_v2  ;;  %2391 = vset.pattern.permute.xlu0 (%p1143_p2), %v2491_v10  ;;  %vm1342_vm4 = vcmask (%p1143_p2), 87040  }
 0x534   : > { %v1164_v34 = vadd.f32 %v1162_v33, %v1157_v44 }
 0x535   :  { %2129 = vmatpush3.bf16.msra.mxu1 (%p1143_p2), %v1277_v5 }
 0x536   : > { %v1165_v45 = vmax.f32 %v1164_v34, 0.0 }
 0x537   :  { %v1345_v6 = vld [vmem:[%s3349_s2 + $0x8] sm:$0xff] (%p1143_p2)  ;;  %v1344_v8 = vld [vmem:[%s3349_s2] sm:$0xff] (%p1143_p2)  ;;  %v1346_v63 = vld [vmem:[%s3349_s2 + $0x10] sm:$0xff] (%p1143_p2) }
 0x538   : > { %2031 = vst.msk [vmem:[%s1166_s25 + $0x8] sm:$0xff] %vm164_vm10, %v1165_v45  ;;  %vm1351_vm1 = vcmp.gt.f32.partialorder (%p1143_p2), %v1345_v6, 0.0  ;;  %vm1350_vm6 = vcmp.gt.f32.partialorder (%p1143_p2), %v1344_v8, 0.0  ;;  %vm1352_vm7 = vcmp.gt.f32.partialorder (%p1143_p2), %v1346_v63, 0.0  ;;  %v1347_v0 = vld [vmem:[%s3349_s2 + $0x18] sm:$0xff] (%p1143_p2)  ;;  %v1348_v9 = vld [vmem:[%s3349_s2 + $0x20] sm:$0xff] (%p1143_p2) }
 0x539   :  { %v1357_v11 = vsel %vm1351_vm1, 1, %v2482_v24  ;;  %v1356_v1 = vsel %vm1350_vm6, 1, %v2482_v24  ;;  %vm1353_vm8 = vcmp.gt.f32.partialorder %v1347_v0, 0.0  ;;  %v1349_v12 = vld [vmem:[%s3349_s2 + $0x28] sm:$0x3f]  ;;  %v1358_v13 = vsel %vm1352_vm7, 1, %v2482_v24 }
 0x53a   :  { %v1359_v62 = vsel %vm1353_vm8, 1, %v2482_v24  ;;  %vm1354_vm9 = vcmp.gt.f32.partialorder %v1348_v9, 0.0  ;;  %vm1355_vm11 = vcmp.gt.f32.partialorder %v1349_v12, 0.0  ;;  %s2476_s25 = smov 0  }
 0x53b   :  { %v1360_v15 = vsel %vm1354_vm9, 1, %v2482_v24  ;;  %v1361_v18 = vsel %vm1355_vm11, 1, %v2482_v24 }
 0x53f   :  { %v1180_v35 = vld [vmem:[#allocation3 + $0x1] sm:$0xff]  ;;  %v1181_v46 = vld [vmem:[#allocation3 + $0x9] sm:$0xff]  ;;  %v1182_v51 = vld [vmem:[#allocation3 + $0x11] sm:$0xff] }
 0x540   :  { %v1186_v48 = vld [vmem:[#allocation3 + $0x2] sm:$0xff]  ;;  %v2361_v49 = vpack.i.bf16 %v1181_v46, %v1180_v35  ;;  %v1187_v38 = vld [vmem:[#allocation3 + $0xa] sm:$0xff]  ;;  %v1183_v47 = vld [vmem:[#allocation3 + $0x19] sm:$0xff] }
 0x541   :  { %v2371_v52 = vpack.i.bf16 %v1183_v47, %v1182_v51  ;;  %v1188_v53 = vld [vmem:[#allocation3 + $0x12] sm:$0xff]  ;;  %v1189_v54 = vld [vmem:[#allocation3 + $0x1a] sm:$0xff]  ;;  %v2366_v56 = vpack.i.bf16 %v1187_v38, %v1186_v48  ;;  %v1185_v58 = vld [vmem:[#allocation3 + $0x29] sm:$0x3f] }
 0x542   :  { %2362 = vrot.lane.b32.xlu0 %v2361_v49, %s2480_s24  ;;  %v1184_v42 = vld [vmem:[#allocation3 + $0x21] sm:$0xff]  ;;  %v2376_v57 = vpack.i.bf16 %v1189_v54, %v1188_v53  ;;  %v1191_v60 = vld [vmem:[#allocation3 + $0x2a] sm:$0x3f]  ;;  %v1176_v37 = vld [vmem:[#allocation3 + $0x10] sm:$0xff] }
 0x543   :  { %2372 = vrot.lane.b32.xlu1 %v2371_v52, %s2480_s24  ;;  %v1190_v59 = vld [vmem:[#allocation3 + $0x22] sm:$0xff]  ;;  %v2381_v55 = vpack.i.bf16 %v1185_v58, %v1184_v42  ;;  %v1177_v21 = vld [vmem:[#allocation3 + $0x18] sm:$0xff] }
 0x544   :  { %v2386_v4 = vpack.i.bf16 %v1191_v60, %v1190_v59  ;;  %v1174_v22 = vld [vmem:[#allocation3] sm:$0xff]  ;;  %v1175_v23 = vld [vmem:[#allocation3 + $0x8] sm:$0xff] }
 0x545   :  { %v1178_v48 = vld [vmem:[#allocation3 + $0x20] sm:$0xff]  ;;  %v1179_v49 = vld [vmem:[#allocation3 + $0x28] sm:$0x3f] }
 0x546   :  { %2367 = vrot.lane.b32.xlu0 %v2366_v56, %s2484_s5 }
 0x547   :  { %2377 = vrot.lane.b32.xlu1 %v2376_v57, %s2484_s5 }
 0x54a   :  { %2382 = vrot.lane.b32.xlu0 %v2381_v55, %s2480_s24 }
 0x54b   :  { %2387 = vrot.lane.b32.xlu1 %v2386_v4, %s2484_s5 }
 0x54e   :  { %1363 = vperm.xlu0 %2391, %v1356_v1  }
 0x54f   :  { %1366 = vperm.xlu1 %2392, %v1357_v11  }
 0x552   :  { %1372 = vperm.xlu0 %2391, %v1359_v62  }
 0x553   :  { %1369 = vperm.xlu1 %2392, %v1358_v13  }
 0x556   :  { %1378 = vperm.xlu0 %2391, %v1361_v18  }
 0x557   :  { %1375 = vperm.xlu1 %2392, %v1360_v15  }
 0x5b4   :  { %v2363_v3 = vpop.permute.xlu0 %2362 }
 0x5b5   :  { %v2373_v14 = vpop.permute.xlu1 %2372  ;;  %v2365_v19 = vunpack.i.h.bf16 %v2363_v3  ;;  %v2364_v20 = vunpack.i.l.bf16 %v2363_v3 }
 0x5b6   :  { %v2375_v17 = vunpack.i.h.bf16 %v2373_v14  ;;  %v2374_v29 = vunpack.i.l.bf16 %v2373_v14 }
 0x5b7   :  { %v1240_v27 = vsel %vm164_vm10, %v1174_v22, %v2364_v20  ;;  %v1241_v28 = vsel %vm164_vm10, %v1175_v23, %v2365_v19 }
 0x5b8   :  { %v2368_v7 = vpop.permute.xlu0 %2367  ;;  %v1242_v43 = vsel %vm164_vm10, %v1176_v37, %v2374_v29  ;;  %v1243_v32 = vsel %vm164_vm10, %v1177_v21, %v2375_v17 }
 0x5b9   :  { %v2370_v25 = vunpack.i.h.bf16 %v2368_v7  ;;  %v2369_v26 = vunpack.i.l.bf16 %v2368_v7  ;;  %v2378_v30 = vpop.permute.xlu1 %2377 }
 0x5ba   :  { %v2380_v40 = vunpack.i.h.bf16 %v2378_v30  ;;  %v2379_v41 = vunpack.i.l.bf16 %v2378_v30 }
 0x5bb   :  { %v1246_v31 = vsel %vm556_vm2, %v1240_v27, %v2369_v26  ;;  %v1247_v36 = vsel %vm556_vm2, %v1241_v28, %v2370_v25 }
 0x5bc   :  { %v1252_v39 = vpack.c.bf16 %v1247_v36, %v1246_v31  ;;  %v2383_v33 = vpop.permute.xlu0 %2382  ;;  %v1248_v35 = vsel %vm556_vm2, %v1242_v43, %v2379_v41  ;;  %v1249_v46 = vsel %vm556_vm2, %v1243_v32, %v2380_v40 }
 0x5bd   :  { %v2385_v44 = vunpack.i.h.bf16 %v2383_v33  ;;  %v2384_v34 = vunpack.i.l.bf16 %v2383_v33  ;;  %v2388_v45 = vpop.permute.xlu1 %2387  ;;  %v1253_v47 = vpack.c.bf16 %v1249_v46, %v1248_v35 }
 0x5be   :  { %2131 = vmatmul.mubr.msk.bf16.vlgmr.msra.gmra.mrb[8].mxu1 %vm581_vm3, %v1252_v39  ;;  %v2390_v38 = vunpack.i.h.bf16 %v2388_v45  ;;  %v2389_v51 = vunpack.i.l.bf16 %v2388_v45 }
 0x5bf   :  { %2134 = vmatprep.mubr.msk.bf16.mxu1 %vm2488_vm14, %v2487_v2  ;;  %v1244_v52 = vsel %vm164_vm10, %v1178_v48, %v2384_v34  ;;  %v1245_v53 = vsel %vm164_vm10, %v1179_v49, %v2385_v44 }
 0x5c0   :  { %v1250_v54 = vsel %vm556_vm2, %v1244_v52, %v2389_v51  ;;  %v1251_v56 = vsel %vm556_vm2, %v1245_v53, %v2390_v38 }
 0x5c1   :  { %v1254_v42 = vpack.c.bf16 %v1251_v56, %v1250_v54 }
 0x5c6   :  { %2135 = vmatmul.mubr.msk.bf16.gmra.mrb[12].mxu1 %vm581_vm3, %v1253_v47 }
 0x5c7   :  { %2138 = vmatprep.mubr.msk.bf16.mxu1 %vm2488_vm14, %v2487_v2 }
 0x5cd   :  { %v3163_v57 = vpop.permute.xlu0 %1363 }
 0x5ce   :  { %2139 = vmatmul.mubr.msk.bf16.gmra.mrb[16].mxu1 %vm581_vm3, %v1254_v42  ;;  %vm1380_vm12 = vcmp.eq.s32.totalorder %v3163_v57, 1  ;;  %v3166_v58 = vpop.permute.xlu1 %1366 }
 0x5cf   :  { %vm1381_vm10 = vcmp.eq.s32.totalorder %v3166_v58, 1 }
 0x5d1   :  { %v1373_v10 = vpop.permute.xlu0 %1372 }
 0x5d2   :  { %v1370_v63 = vpop.permute.xlu1 %1369  ;;  %vm1383_vm3 = vcmp.eq.s32.totalorder %v1373_v10, 1 }
 0x5d3   :  { %vm1382_vm2 = vcmp.eq.s32.totalorder %v1370_v63, 1 }
 0x5d5   :  { %v1379_v19 = vpop.permute.xlu0 %1378 }
 0x5d6   :  { %v1376_v3 = vpop.permute.xlu1 %1375  ;;  %vm1385_vm5 = vcmp.eq.s32.totalorder %v1379_v19, 1  ;;  %v1452_v19 = vld [vmem:[%s3324_s13] sm:$0x1] }
 0x5d7   :  { %vm1384_vm15 = vcmp.eq.s32.totalorder %v1376_v3, 1 }
 0x691   :  { %v1313_v59 = vpop.f32.mrb[8].mxu1 }
 0x692   :  { %1337 = vst.msk [vmem:[#allocation2] sm:$0xff] %vm1336_vm13, %v1313_v59  ;;  %v1386_v60 = vsel %vm1380_vm12, %v1313_v59, 0.0  ;;  %v2132_v50 = vpop.f32.mrb[9].mxu1 }
 0x693   :  { %v1316_v61 = vpop.f32.mrb[10].mxu1  ;;  %v1392_v5 = vsel %vm1336_vm13, %v1386_v60, 0.0 }
 0x694   :  { %1338 = vst.msk [vmem:[#allocation2 + $0x8] sm:$0xff] %vm1336_vm13, %v1316_v61  ;;  %v1387_v55 = vsel %vm1381_vm10, %v1316_v61, 0.0  ;;  %v2133_v4 = vpop.f32.mrb[11].mxu1 }
 0x695   :  { %v1393_v6 = vsel %vm1336_vm13, %v1387_v55, 0.0 }
 0x696   :  { %v1394_v8 = vadd.f32 %v1393_v6, %v1392_v5 }
 0x699   :  { %v1321_v0 = vpop.f32.mrb[12].mxu1  ;;  %v1410_v41 = vld [vmem:[#allocation2] sm:$0xff] }
 0x69a   :  { %1339 = vst.msk [vmem:[#allocation2 + $0x10] sm:$0xff] %vm1336_vm13, %v1321_v0  ;;  %v1388_v11 = vsel %vm1382_vm2, %v1321_v0, 0.0  ;;  %v2136_v1 = vpop.f32.mrb[13].mxu1 }
 0x69b   :  { %v1395_v9 = vsel %vm1336_vm13, %v1388_v11, 0.0  ;;  %v1324_v12 = vpop.f32.mrb[14].mxu1  ;;  %v1411_v33 = vld [vmem:[#allocation2 + $0x8] sm:$0xff] }
 0x69c   :  { %v1396_v13 = vadd.f32 %v1395_v9, %v1394_v8  ;;  %1340 = vst.msk [vmem:[#allocation2 + $0x18] sm:$0xff] %vm1336_vm13, %v1324_v12  ;;  %v1389_v62 = vsel %vm1383_vm3, %v1324_v12, 0.0  ;;  %v2137_v15 = vpop.f32.mrb[15].mxu1 }
 0x69d   :  { %v1397_v18 = vsel %vm1336_vm13, %v1389_v62, 0.0 }
 0x69e   :  { %v1398_v14 = vadd.f32 %v1397_v18, %v1396_v13 }
 0x6a1   :  { %v1329_v20 = vpop.f32.mrb[16].mxu1  ;;  %v1412_v43 = vld [vmem:[#allocation2 + $0x10] sm:$0xff] }
 0x6a2   :  { %1341 = vst.msk [vmem:[#allocation2 + $0x20] sm:$0xff] %vm1336_vm13, %v1329_v20  ;;  %v1390_v22 = vsel %vm1384_vm15, %v1329_v20, 0.0  ;;  %v2140_v23 = vpop.f32.mrb[17].mxu1 }
 0x6a3   :  { %v1399_v7 = vsel %vm1336_vm13, %v1390_v22, 0.0  ;;  %v1332_v25 = vpop.f32.mrb[18].mxu1  ;;  %v1413_v32 = vld [vmem:[#allocation2 + $0x18] sm:$0xff]  ;;  %v1456_v23 = vld [vmem:[%s3325_s14] sm:$0x1] }
 0x6a4   :  { %v1400_v26 = vadd.f32 %v1399_v7, %v1398_v14  ;;  %1343 = vst.msk [vmem:[#allocation2 + $0x28] sm:$0x3f] %vm1342_vm4, %v1332_v25  ;;  %v1391_v27 = vsel %vm1385_vm5, %v1332_v25, 0.0  ;;  %v2141_v28 = vpop.f32.mrb[19].mxu1 }
 0x6a5   :  { %v1401_v17 = vsel %vm1342_vm4, %v1391_v27, 0.0 }
 0x6a6   :  { %v1402_v29 = vadd.f32 %v1401_v17, %v1400_v26 }
 0x6a8   :  { %v1403_v30 = vrot.slane %v1402_v29, 4 }
 0x6a9   :  { %v1414_v44 = vld [vmem:[#allocation2 + $0x20] sm:$0xff] }
 0x6aa   :  { %v1404_v31 = vadd.f32 %v1403_v30, %v1402_v29 }
 0x6ab   :  { %v1415_v34 = vld [vmem:[#allocation2 + $0x28] sm:$0x3f] }
 0x6ac   :  { %v1405_v36 = vrot.slane %v1404_v31, 2 }
 0x6ae   :  { %v1406_v37 = vadd.f32 %v1405_v36, %v1404_v31 }
 0x6b0   :  { %v1407_v21 = vrot.slane %v1406_v37, 1 }
 0x6b2   :  { %v1408_v39 = vadd.f32 %v1407_v21, %v1406_v37 }
 0x6b4   :  { %v1409_v40 = vmul.f32 0.0625, %v1408_v39 }
 0x6b6   :  { %v1416_v45 = vsub.f32 %v1410_v41, %v1409_v40  ;;  %v1417_v35 = vsub.f32 %v1411_v33, %v1409_v40  ;;  %v1418_v46 = vsub.f32 %v1412_v43, %v1409_v40  ;;  %v1419_v48 = vsub.f32 %v1413_v32, %v1409_v40 }
 0x6b7   :  { %v1420_v49 = vsub.f32 %v1414_v44, %v1409_v40  ;;  %v1421_v38 = vsub.f32 %v1415_v34, %v1409_v40 }
 0x6b8   :  { %v1422_v51 = vsel %vm1380_vm12, %v1416_v45, 0.0  ;;  %v1423_v47 = vsel %vm1381_vm10, %v1417_v35, 0.0  ;;  %v1424_v52 = vsel %vm1382_vm2, %v1418_v46, 0.0  ;;  %v1425_v53 = vsel %vm1383_vm3, %v1419_v48, 0.0 }
 0x6b9   :  { %v1428_v54 = vmul.f32 %v1422_v51, %v1422_v51  ;;  %v1429_v56 = vmul.f32 %v1423_v47, %v1423_v47  ;;  %v1426_v42 = vsel %vm1384_vm15, %v1420_v49, 0.0  ;;  %v1430_v59 = vmul.f32 %v1424_v52, %v1424_v52 }
 0x6ba   :  { %v1431_v60 = vmul.f32 %v1425_v53, %v1425_v53  ;;  %v1427_v57 = vsel %vm1385_vm5, %v1421_v38, 0.0  ;;  %v1432_v4 = vmul.f32 %v1426_v42, %v1426_v42 }
 0x6bb   :  { %v1434_v50 = vsel %vm1336_vm13, %v1428_v54, 0.0  ;;  %v1435_v61 = vsel %vm1336_vm13, %v1429_v56, 0.0  ;;  %v1437_v58 = vsel %vm1336_vm13, %v1430_v59, 0.0  ;;  %v1433_v6 = vmul.f32 %v1427_v57, %v1427_v57 }
 0x6bc   :  { %v1436_v55 = vadd.f32 %v1435_v61, %v1434_v50  ;;  %v1439_v8 = vsel %vm1336_vm13, %v1431_v60, 0.0  ;;  %v1441_v10 = vsel %vm1336_vm13, %v1432_v4, 0.0 }
 0x6bd   :  { %v1443_v11 = vsel %vm1342_vm4, %v1433_v6, 0.0 }
 0x6be   :  { %v1438_v5 = vadd.f32 %v1437_v58, %v1436_v55 }
 0x6c0   :  { %v1440_v63 = vadd.f32 %v1439_v8, %v1438_v5 }
 0x6c2   :  { %v1442_v0 = vadd.f32 %v1441_v10, %v1440_v63 }
 0x6c4   :  { %v1444_v1 = vadd.f32 %v1443_v11, %v1442_v0 }
 0x6c6   :  { %v1445_v9 = vrot.slane %v1444_v1, 4 }
 0x6c8   :  { %v1446_v12 = vadd.f32 %v1445_v9, %v1444_v1 }
 0x6ca   :  { %v1447_v13 = vrot.slane %v1446_v12, 2 }
 0x6cc   :  { %v1448_v62 = vadd.f32 %v1447_v13, %v1446_v12 }
 0x6ce   :  { %v1449_v15 = vrot.slane %v1448_v62, 1 }
 0x6d0   :  { %v1450_v18 = vadd.f32 %v1449_v15, %v1448_v62 }
 0x6d2   :  { %v1451_v3 = vmul.f32 0.0625, %v1450_v18 }
 0x6d4   :  { %v1453_v14 = vadd.f32 1e-05, %v1451_v3 }
 0x6d6   :  { %2395 = vrsqrt.f32 %v1453_v14 }
 0x6e0   :  { %v2396_v20 = vpop.eup %2395 }
 0x6e1   :  { %v1455_v22 = vmul.f32 %v2396_v20, %v1452_v19 }
 0x6e3   :  { %v1457_v7 = vmul.f32 %v1455_v22, %v1409_v40 }
 0x6e5   :  { %v1458_v25 = vsub.f32 %v1456_v23, %v1457_v7 }
 0x6e6 LB: > { %vm1495_vm1 = vcmask 84992   ;;  %s2037_s10 = sshll.u32 %s2478_s25, 4  ;;  %s1964_s11 = smul.u32 24, %s2478_s25  ;;  %v1477_v26 = vrot.slane %v1455_v22, %v2827_v16  ;;  %v2492_v27 = vmov 0.0   ;;  %s2478_s25 = sphi %s2476_s25, %s1464_s25  }
 0x6e7   : > { %s1491_s3 = scalar_lea.vmem [#allocation4], %s2037_s10  ;;  %v1484_v28 = vrot.slane %v1458_v25, %v2827_v16  ;;  %s1464_s25 = sadd.s32 1, %s2478_s25  }
 0x6e8   : > { %1492 = vst.msk [vmem:[%s1491_s3] sm:$0xff] %vm1336_vm13, %v2492_v27  ;;  %s1965_s13 = scalar_lea.vmem [#allocation2], %s1964_s11  ;;  %p1461_p3 = scmp.ge.s32.totalorder %s1464_s25, 2  }
 0x6e9   : > { %2041 = vst.msk [vmem:[%s1491_s3 + $0xc] sm:$0xf] %vm1495_vm1, %v2492_v27  ;;  %v2038_v17 = vld [vmem:[%s1965_s13 + $0x7] ss:$2 sm:$0xf]  ;;  %2160 = vmatprep.mubr.msk.f32.mxu1 (%p1461_p3), %vm2488_vm14, %v2487_v2  ;;  %vm1582_vm6 = vcmask (%p1461_p3), 1040384  }
 0x6ea   : > { %v2039_v29 = vld [vmem:[%s1965_s13 + $0x8] ss:$2 sm:$0xf]  ;;  %v1479_v30 = vmul.f32 %v2038_v17, %v1477_v26  ;;  %s2493_s14 = smov (%p1461_p3), 11   ;;  %v2419_v49 = vld [vmem:[%s3326_s15] sm:$0xff] (%p1461_p3)   ;;  %s2494_s26 = smov (%p1461_p3), 22  }
 0x6eb   : > { %v1487_v31 = vmul.f32 %v2039_v29, %v1477_v26  ;;  %v2495_v51 = vmov (%p1461_p3), 4   ;;  %2142 = vmatprep.subr.bf16.mxu0 (%p1461_p3), %v2419_v49  ;;  %v2420_v47 = vld [vmem:[%s3326_s15 + $0x8] sm:$0xff] (%p1461_p3)   ;;  %v1584_v52 = vsel (%p1461_p3), %vm1582_vm6, 65535, %v2482_v24  ;;  %v2421_v53 = vld [vmem:[%s3326_s15 + $0x10] ss:$0 sps:$4 sm:$0x11] (%p1461_p3)  }
 0x6ec   : > { %v1486_v36 = vadd.f32 %v1484_v28, %v1479_v30  ;;  %2417 = vset.pattern.permute.xlu0 (%p1461_p3), %v2495_v51  ;;  %2418 = vset.pattern.permute.xlu1 (%p1461_p3), %v2495_v51  ;;  %s3350_s24 = sld [smem:[#allocation9_spill]] (%p1461_p3)  ;;  %v1586_v60 = vand.u32 (%p1461_p3), %v2421_v53, %v1584_v52  ;;  %vm1548_vm12 = vcmask (%p1461_p3), 179200   ;;  %vm1575_vm10 = vcmask (%p1461_p3), 269312   ;;  %v1827_v17 = vld [vmem:[%s3329_s18 + $0x8] sm:$0x7] (%p1461_p3)  ;;  %s2498_s9 = smov (%p1461_p3), [#allocation5]  }
 0x6ed   : > { %v1488_v37 = vadd.f32 %v1487_v31, %v1484_v28  ;;  %1463 = sbr.rel (!%p1461_p3) target bundleno = 1766 (0x6e6), region = 179  ;;  %2143 = vmatpush3.bf16.msra.mxu0 (%p1461_p3), %v2419_v49  ;;  %v2496_v27 = vmov (%p1461_p3), 0.0|0.0   ;;  %vm1838_vm2 = vcmask (%p1461_p3), 1042432   ;;  %vm2497_vm3 = vmmov (%p1461_p3), 1   ;;  %v1826_v28 = vld [vmem:[%s3329_s18] sm:$0xff] (%p1461_p3)  ;;  %s1920_s23 = sshll.u32 (%p1461_p3), %s2498_s9, 4  ;;  %s1921_s23 = int_to_ptr.vmem [resolvable:$true] %s1920_s23 }
 0x6ee   :  { %2144 = vmatprep.subr.bf16.mxu0 (%p1461_p3), %v2420_v47  ;;  %2170 = vmatprep.subr.bf16.mxu1 (%p1461_p3), %v2496_v27  ;;  %vm2179_vm15 = vmpackc.low (%p1461_p3), %vm1838_vm2, %vm2497_vm3  ;;  %v2178_v29 = vpack.c.bf16 (%p1461_p3), %v1827_v17, %v1826_v28  ;;  %v1721_v17 = vld [vmem:[%s3328_s17] sm:$0x1] (%p1461_p3)  ;;  %p2429_p5 = scmp.lt.s32.totalorder (%p1461_p3), %s1921_s23, %s1921_s23 }
 0x6ef   : > { %v1489_v21 = vmax.f32 %v1486_v36, %v1488_v37 }
 0x6f1   : > { %v1490_v39 = vmax.f32 %v1489_v21, 0.0  ;;  %2145 = vmatpush3.bf16.msra.mxu0 (%p1461_p3), %v2420_v47 }
 0x6f2   :  { %v1642_v54 = vld [vmem:[%s3350_s24 + $0x8] sm:$0xff] (%p1461_p3)  ;;  %v1641_v56 = vld [vmem:[%s3350_s24] sm:$0xff] (%p1461_p3)  ;;  %v1643_v42 = vld [vmem:[%s3350_s24 + $0x10] sm:$0xff] (%p1461_p3)  ;;  %2146 = vmatprep.subr.bf16.mxu0 (%p1461_p3), %v1586_v60 }
 0x6f3   : > { %2043 = vst.msk [vmem:[%s1491_s3 + $0x8] sm:$0xf] %vm1495_vm1, %v1490_v39  ;;  %vm1646_vm7 = vcmp.gt.f32.partialorder (%p1461_p3), %v1642_v54, 0.0  ;;  %v1644_v59 = vld [vmem:[%s3350_s24 + $0x18] sm:$0x3f] (%p1461_p3)  ;;  %vm1645_vm8 = vcmp.gt.f32.partialorder (%p1461_p3), %v1641_v56, 0.0 }
 0x6f4   :  { %v1650_v50 = vsel %vm1646_vm7, 1, %v2482_v24  ;;  %v1649_v61 = vsel %vm1645_vm8, 1, %v2482_v24  ;;  %vm1648_vm9 = vcmp.gt.f32.partialorder %v1644_v59, 0.0  ;;  %vm1647_vm11 = vcmp.gt.f32.partialorder %v1643_v42, 0.0  ;;  %s3351_s3 = sld [smem:[#allocation10_spill]] }
 0x6f5   :  { %v1652_v57 = vsel %vm1648_vm9, 1, %v2482_v24  ;;  %v1651_v55 = vsel %vm1647_vm11, 1, %v2482_v24  ;;  %2147 = vmatpush3.bf16.msra.mxu0 %v1586_v60  ;;  %vm1749_vm7 = vcmask 244736  }
 0x6f6   :  { %2177 = vmatprep.subr.bf16.mxu0 %v2496_v27 }
 0x6fa   :  { %v1504_v40 = vld [vmem:[#allocation4 + $0x1] sm:$0xff]  ;;  %v1505_v41 = vld [vmem:[#allocation4 + $0x9] sm:$0xff]  ;;  %v1506_v44 = vld [vmem:[#allocation4 + $0x11] sm:$0xff] }
 0x6fb   :  { %v1508_v33 = vld [vmem:[#allocation4 + $0x2] sm:$0xff]  ;;  %v2397_v43 = vpack.i.bf16 %v1505_v41, %v1504_v40  ;;  %v1509_v32 = vld [vmem:[#allocation4 + $0xa] sm:$0xff]  ;;  %v1507_v34 = vld [vmem:[#allocation4 + $0x19] sm:$0x3f] }
 0x6fc   :  { %v2407_v45 = vpack.i.bf16 %v1509_v32, %v1508_v33  ;;  %v1510_v35 = vld [vmem:[#allocation4 + $0x12] sm:$0xff]  ;;  %v1511_v46 = vld [vmem:[#allocation4 + $0x1a] sm:$0x3f]  ;;  %v2402_v48 = vpack.i.bf16 %v1507_v34, %v1506_v44  ;;  %v1500_v58 = vld [vmem:[#allocation4] sm:$0xff] }
 0x6fd   :  { %2398 = vrot.lane.b32.xlu0 %v2397_v43, %s2493_s14  ;;  %v2412_v38 = vpack.i.bf16 %v1511_v46, %v1510_v35  ;;  %v1501_v5 = vld [vmem:[#allocation4 + $0x8] sm:$0xff]  ;;  %v1502_v12 = vld [vmem:[#allocation4 + $0x10] sm:$0xff]  ;;  %v1503_v13 = vld [vmem:[#allocation4 + $0x18] sm:$0x3f] }
 0x6fe   :  { %2408 = vrot.lane.b32.xlu1 %v2407_v45, %s2494_s26 }
 0x701   :  { %2403 = vrot.lane.b32.xlu0 %v2402_v48, %s2493_s14 }
 0x702   :  { %2413 = vrot.lane.b32.xlu1 %v2412_v38, %s2494_s26  ;;  %s2424_s26 = scalar_lea.vmem %s1921_s23, 32 }
 0x703   :  { %p2425_p4 = scmp.ne.s32.totalorder %s1921_s23, %s2424_s26  ;;  %p2430_p6 = scmp.lt.s32.totalorder %s2424_s26, %s2424_s26 }
 0x705   :  { %1654 = vperm.xlu0 %2417, %v1649_v61   ;;  %p2431_p7 = por %p2430_p6, %p2429_p5 }
 0x706   :  { %1657 = vperm.xlu1 %2418, %v1650_v50  }
 0x707   :  { %p2432_p8 = pnand %p2431_p7, %p2425_p4 }
 0x709   :  { %1663 = vperm.xlu0 %2417, %v1652_v57  }
 0x70a   :  { %1660 = vperm.xlu1 %2418, %v1651_v55  }
 0x76f   :  { %v2399_v4 = vpop.permute.xlu0 %2398 }
 0x770   :  { %v2401_v6 = vunpack.i.h.bf16 %v2399_v4  ;;  %v2400_v8 = vunpack.i.l.bf16 %v2399_v4  ;;  %v2409_v63 = vpop.permute.xlu1 %2408 }
 0x771   :  { %v2411_v10 = vunpack.i.h.bf16 %v2409_v63  ;;  %v2410_v0 = vunpack.i.l.bf16 %v2409_v63 }
 0x772   :  { %v1544_v11 = vsel %vm1336_vm13, %v1500_v58, %v2400_v8  ;;  %v1545_v1 = vsel %vm1336_vm13, %v1501_v5, %v2401_v6 }
 0x773   :  { %v2404_v9 = vpop.permute.xlu0 %2403  ;;  %v1549_v24 = vsel %vm1548_vm12, %v1544_v11, %v2410_v0  ;;  %v1550_v62 = vsel %vm1548_vm12, %v1545_v1, %v2411_v10 }
 0x774   :  { %v2406_v15 = vunpack.i.h.bf16 %v2404_v9  ;;  %v2405_v18 = vunpack.i.l.bf16 %v2404_v9  ;;  %v2414_v3 = vpop.permute.xlu1 %2413  ;;  %v1553_v14 = vpack.c.bf16 %v1550_v62, %v1549_v24 }
 0x775   :  { %v2416_v19 = vunpack.i.h.bf16 %v2414_v3  ;;  %v2415_v20 = vunpack.i.l.bf16 %v2414_v3 }
 0x776   :  { %v1546_v22 = vsel %vm1336_vm13, %v1502_v12, %v2405_v18  ;;  %v1547_v23 = vsel %vm1336_vm13, %v1503_v13, %v2406_v15  ;;  %2148 = vmatprep.mubr.msk.bf16.mxu0 %vm1575_vm10, %v1553_v14 }
 0x777   :  { %v1551_v7 = vsel %vm1548_vm12, %v1546_v22, %v2415_v20  ;;  %v1552_v25 = vsel %vm1548_vm12, %v1547_v23, %v2416_v19 }
 0x778   :  { %v1554_v26 = vpack.c.bf16 %v1552_v25, %v1551_v7  ;;  %v1717_v25 = vld [vmem:[%s3327_s16] sm:$0x1] }
 0x77a   :  { %2149 = vmatmul.mubr.msk.bf16.vlgmr.msra.gmra.mrb[20].mxu0 %vm1575_vm10, %v1554_v26 }
 0x77b   :  { %2167 = vmatprep.mubr.msk.f32.mxu0 %vm2488_vm14, %v2487_v2  ;;  %2180 = vmatpush3.bf16.msk.msra.mxu0 %vm2179_vm15, %v2178_v29 }
 0x784   :  { %v1655_v30 = vpop.permute.xlu0 %1654 }
 0x785   :  { %v1658_v2 = vpop.permute.xlu1 %1657  ;;  %vm1665_vm14 = vcmp.eq.s32.totalorder %v1655_v30, 1 }
 0x786   :  { %vm1666_vm1 = vcmp.eq.s32.totalorder %v1658_v2, 1 }
 0x788   :  { %v1664_v37 = vpop.permute.xlu0 %1663 }
 0x789   :  { %v1661_v31 = vpop.permute.xlu1 %1660  ;;  %vm1668_vm6 = vcmp.eq.s32.totalorder %v1664_v37, 1 }
 0x78a   :  { %vm1667_vm5 = vcmp.eq.s32.totalorder %v1661_v31, 1 }
 0x84d   :  { %v2150_v36 = vpop.f32.mrb[20].mxu0 }
 0x84e   :  { %1639 = vst.msk [vmem:[#allocation2 + $0x10] sm:$0xff] %vm1336_vm13, %v2150_v36  ;;  %v1622_v21 = vpop.f32.mrb[21].mxu0  ;;  %v1671_v33 = vsel %vm1667_vm5, %v2150_v36, 0.0 }
 0x84f   :  { %1637 = vst.msk [vmem:[#allocation2] sm:$0xff] %vm1336_vm13, %v1622_v21  ;;  %v1669_v39 = vsel %vm1665_vm14, %v1622_v21, 0.0  ;;  %v2151_v40 = vpop.f32.mrb[22].mxu0  ;;  %v1676_v35 = vsel %vm1336_vm13, %v1671_v33, 0.0 }
 0x850   :  { %1640 = vst.msk [vmem:[#allocation2 + $0x18] sm:$0x3f] %vm1342_vm4, %v2151_v40  ;;  %v1625_v41 = vpop.f32.mrb[23].mxu0  ;;  %v1673_v32 = vsel %vm1336_vm13, %v1669_v39, 0.0  ;;  %v1672_v34 = vsel %vm1668_vm6, %v2151_v40, 0.0 }
 0x851   :  { %1638 = vst.msk [vmem:[#allocation2 + $0x8] sm:$0xff] %vm1336_vm13, %v1625_v41  ;;  %v1670_v43 = vsel %vm1666_vm1, %v1625_v41, 0.0  ;;  %v1678_v48 = vsel %vm1342_vm4, %v1672_v34, 0.0 }
 0x852   :  { %v1674_v44 = vsel %vm1336_vm13, %v1670_v43, 0.0 }
 0x853   :  { %v1675_v45 = vadd.f32 %v1674_v44, %v1673_v32 }
 0x855   :  { %v1677_v46 = vadd.f32 %v1676_v35, %v1675_v45  ;;  %v1689_v42 = vld [vmem:[#allocation2 + $0x10] sm:$0xff] }
 0x856   :  { %v1687_v59 = vld [vmem:[#allocation2] sm:$0xff] }
 0x857   :  { %v1679_v49 = vadd.f32 %v1678_v48, %v1677_v46  ;;  %v1690_v50 = vld [vmem:[#allocation2 + $0x18] sm:$0x3f] }
 0x858   :  { %v1688_v60 = vld [vmem:[#allocation2 + $0x8] sm:$0xff] }
 0x859   :  { %v1680_v38 = vrot.slane %v1679_v49, 4 }
 0x85b   :  { %v1681_v51 = vadd.f32 %v1680_v38, %v1679_v49  ;;  %v2051_v38 = vld [vmem:[%s3330_s19] ss:$0 sm:$0xff] }
 0x85d   :  { %v1682_v47 = vrot.slane %v1681_v51, 2 }
 0x85f   :  { %v1683_v52 = vadd.f32 %v1682_v47, %v1681_v51 }
 0x861   :  { %v1684_v53 = vrot.slane %v1683_v52, 1 }
 0x863   :  { %v1685_v54 = vadd.f32 %v1684_v53, %v1683_v52 }
 0x865   :  { %v1686_v56 = vmul.f32 0.125, %v1685_v54 }
 0x867   :  { %v1691_v61 = vsub.f32 %v1687_v59, %v1686_v56  ;;  %v1692_v57 = vsub.f32 %v1688_v60, %v1686_v56  ;;  %v1693_v55 = vsub.f32 %v1689_v42, %v1686_v56  ;;  %v1694_v4 = vsub.f32 %v1690_v50, %v1686_v56 }
 0x869   :  { %v1695_v58 = vsel %vm1665_vm14, %v1691_v61, 0.0  ;;  %v1696_v5 = vsel %vm1666_vm1, %v1692_v57, 0.0  ;;  %v1697_v6 = vsel %vm1667_vm5, %v1693_v55, 0.0  ;;  %v1698_v8 = vsel %vm1668_vm6, %v1694_v4, 0.0 }
 0x86a   :  { %v1699_v63 = vmul.f32 %v1695_v58, %v1695_v58  ;;  %v1700_v10 = vmul.f32 %v1696_v5, %v1696_v5  ;;  %v1701_v0 = vmul.f32 %v1697_v6, %v1697_v6  ;;  %v1702_v11 = vmul.f32 %v1698_v8, %v1698_v8 }
 0x86c   :  { %v1703_v1 = vsel %vm1336_vm13, %v1699_v63, 0.0  ;;  %v1704_v9 = vsel %vm1336_vm13, %v1700_v10, 0.0  ;;  %v1706_v13 = vsel %vm1336_vm13, %v1701_v0, 0.0  ;;  %v1708_v62 = vsel %vm1342_vm4, %v1702_v11, 0.0  ;;  %vm2175_vm4 = vmpackc.low %vm197_vm0, %vm2497_vm3 }
 0x86d   :  { %v1705_v12 = vadd.f32 %v1704_v9, %v1703_v1  ;;  %vm1912_vm0 = vcmask 33792  }
 0x86f   :  { %v1707_v24 = vadd.f32 %v1706_v13, %v1705_v12 }
 0x871   :  { %v1709_v15 = vadd.f32 %v1708_v62, %v1707_v24 }
 0x873   :  { %v1710_v18 = vrot.slane %v1709_v15, 4 }
 0x875   :  { %v1711_v3 = vadd.f32 %v1710_v18, %v1709_v15 }
 0x877   :  { %v1712_v14 = vrot.slane %v1711_v3, 2 }
 0x879   :  { %v1713_v19 = vadd.f32 %v1712_v14, %v1711_v3 }
 0x87b   :  { %v1714_v20 = vrot.slane %v1713_v19, 1 }
 0x87d   :  { %v1715_v22 = vadd.f32 %v1714_v20, %v1713_v19 }
 0x87f   :  { %v1716_v23 = vmul.f32 0.125, %v1715_v22 }
 0x881   :  { %v1718_v7 = vadd.f32 1e-05, %v1716_v23 }
 0x883   :  { %2422 = vrsqrt.f32 %v1718_v7 }
 0x88d   :  { %v2423_v26 = vpop.eup %2422 }
 0x88e   :  { %v1720_v28 = vmul.f32 %v2423_v26, %v1717_v25 }
 0x890   :  { %v1722_v29 = vmul.f32 %v1720_v28, %v1686_v56  ;;  %v1728_v2 = vrot.slane %v1720_v28, %v2827_v16 }
 0x892   :  { %v1723_v30 = vsub.f32 %v1721_v17, %v1722_v29  ;;  %v1730_v31 = vmul.f32 %v1728_v2, %v1687_v59  ;;  %v1731_v36 = vmul.f32 %v1728_v2, %v1688_v60  ;;  %v1732_v21 = vmul.f32 %v1728_v2, %v1689_v42 }
 0x893   :  { %v1733_v39 = vmul.f32 %v1728_v2, %v1690_v50 }
 0x894   :  { %v1738_v37 = vrot.slane %v1723_v30, %v2827_v16  ;;  %v1748_v16 = vld [vmem:[%s3351_s3] sm:$0x3] }
 0x896   :  { %v1740_v40 = vadd.f32 %v1738_v37, %v1730_v31  ;;  %v1741_v41 = vadd.f32 %v1738_v37, %v1731_v36  ;;  %v1742_v33 = vadd.f32 %v1738_v37, %v1732_v21  ;;  %v1743_v43 = vadd.f32 %v1738_v37, %v1733_v39 }
 0x898   :  { %v1744_v32 = vmax.f32 %v1740_v40, 0.0  ;;  %v1745_v44 = vmax.f32 %v1741_v41, 0.0  ;;  %v1746_v45 = vmax.f32 %v1742_v33, 0.0  ;;  %v1747_v35 = vmax.f32 %v1743_v43, 0.0 }
 0x89a   :  { %v2171_v34 = vpack.c.bf16 %v1745_v44, %v1744_v32  ;;  %v2174_v46 = vpack.c.bf16 %v1747_v35, %v1746_v45 }
 0x89c   :  { %2172 = vmatpush3.bf16.msra.mxu1 %v2171_v34 }
 0x89d   :  { %2173 = vmatprep.subr.bf16.mxu1 %v2496_v27 }
 0x8a0   :  { %2176 = vmatpush3.bf16.msk.msra.mxu1 %vm2175_vm4, %v2174_v46 }
 0x8a3   :  { %2161 = vmatmul.mubr.msk.f32.vlgmr.msra.gmra.mrb[20].mxu1 %vm1749_vm7, %v1748_v16 }
 0x976   :  { %v1822_v48 = vpop.f32.mrb[20].mxu1 }
 0x977   :  { %v2162_v49 = vpop.f32.mrb[21].mxu1  ;;  %2168 = vmatmul.mubr.msk.f32.vlgmr.msra.gmra.mrb[24].mxu0 %vm1336_vm13, %v1822_v48 }
 0xa4a   :  { %v1908_v27 = vpop.f32.mrb[24].mxu0 }
 0xa4b   :  { %v1909_v51 = vadd.f32 %v2051_v38, %v1908_v27  ;;  %v2169_v47 = vpop.f32.mrb[25].mxu0 }
 0xa4d   :  { %1913 = vst.msk [vmem:[#allocation5] sm:$0x3] %vm1912_vm0, %v1909_v51 }
 0xa4e   :  { %2435 = shalt.err (!%p2432_p8)
}
 0xa4f   :  { %s2436_s12 = scalar_lea.hbm %s3331_s20, 32 }
 0xa50   :  { %p2437_p9 = scmp.ne.s32.totalorder %s3331_s20, %s2436_s12  ;;  %p2440_p10 = scmp.lt.u32.totalorder %s2436_s12, %s3331_s20 }
 0xa52   :  { %p2442_p11 = pnand %p2440_p10, %p2437_p9 }
 0xa54   :  { %2445 = shalt.err (!%p2442_p11)
}
 0xa55   :  { %1923 = dma.vmem_to_hbm [thread:$0]  %s1921_s23, 32, %s3331_s20, [#allocation6]  }
 0xa56   :  { %2462 = dma.done.wait [#allocation6], 32  }
 0xa57   :  { %2463 = vsyncadd [#allocation6], 4294967264 }
 0xa58   :  { %1927 = vsyncpa [#allocation6], 1 }

</bundles_post_ra>
